<compile_context>
chip_gen: v5e
topology: v5e:2x2
jax: 0.10.0
libtpu: 0.0.40
codegen_flags: <defaults>
</compile_context>

<pallas_src>
import functools

import jax
import jax.numpy as jnp
from jax import lax
from jax.experimental import pallas as pl
from jax.experimental.pallas import tpu as pltpu


# ----------------------------- helpers (glue) -------------------------------

def _interp_matrix(n_in, n_out):
    """Row-stochastic 1-D bilinear interpolation matrix, align_corners=True."""
    if n_in == 1:
        return jnp.ones((n_out, 1), jnp.float32)
    src = jnp.arange(n_out, dtype=jnp.float32) * ((n_in - 1) / (n_out - 1))
    i0 = jnp.clip(jnp.floor(src).astype(jnp.int32), 0, n_in - 2)
    frac = src - i0.astype(jnp.float32)
    rows = jnp.arange(n_out)
    a = jnp.zeros((n_out, n_in), jnp.float32)
    a = a.at[rows, i0].add(1.0 - frac)
    a = a.at[rows, i0 + 1].add(frac)
    return a


def _band_weight(w_dy, w_out, c, cout):
    """Block-banded (Toeplitz along W) conv weight for one ky slice.

    w_dy: (3, c, cout) conv weights (kx, cin_slice, cout) at a fixed ky.
    Returns B of shape ((w_out+2)*c, w_out*cout) with
      B[(w+kx)*c + ci, w*cout + co] = w_dy[kx, ci, co]
    so that (padded_row_slab @ B)[h, w*cout+co] sums over (kx, ci).
    """
    b = jnp.zeros(((w_out + 2) * c, w_out * cout), jnp.float32)
    eye = jnp.eye(w_out, dtype=jnp.float32)
    for kx in range(3):
        p = jnp.zeros((w_out + 2, w_out), jnp.float32).at[kx:kx + w_out, :].set(eye)
        b = b + jnp.kron(p, w_dy[kx])
    return b


# ----------------------------- fused Pallas kernel ---------------------------

def _up_fused_kernel(x1_ref, x2_ref, mh_ref, kw_ref, wt1_ref, b1_ref,
                     wt2_ref, b2_ref, o_ref, xp_ref, y1p_ref,
                     *, h2, w2, c1, c2, cout, h2u, w2u, py0, px0, zero_full_x1):
    # x1_ref:  (1, h1, w1*c1)        bf16
    # x2_ref:  (1, h2, w2*c2)        bf16
    # mh_ref:  (h2u, h1)             bf16   H-pass upsample matrix
    # kw_ref:  (w1*c1, w2u*c1)       bf16   kron(mw^T, I_c1) W-pass matrix
    # wt1_ref: (3, (w2+2)*(c1+c2), w2*cout) bf16  block-banded conv1 (BN folded)
    # wt2_ref: (3, (w2+2)*cout,     w2*cout) bf16  block-banded conv2 (BN folded)
    # b1/b2:   (1, w2*cout) f32 tiled biases
    # o_ref:   (1, h2, w2*cout) bf16 (lane-dense store)
    # xp_ref:  (h2+2, (w2+2)*(c1+c2)) bf16 scratch  (fused pad + concat)
    # y1p_ref: (h2+2, (w2+2)*cout)    bf16 scratch  (padded conv1 output)
    ka = (w2 + 2) * c2            # lanes holding padded x2
    kb = (w2 + 2) * c1            # lanes holding padded upsampled x1

    # ---- bilinear 2x upsample of x1 (align_corners=True), all on the MXU:
    #      H pass is a plain matmul, W pass uses kron(mw^T, I) -> no transpose.
    u = jnp.dot(mh_ref[...], x1_ref[0],
                preferred_element_type=jnp.float32).astype(jnp.bfloat16)      # (h2u, w1*c1)
    x1_up = jnp.dot(u, kw_ref[...],
                    preferred_element_type=jnp.float32).astype(jnp.bfloat16)  # (h2u, w2u*c1)

    # ---- fused pad + channel concat into ONE lane-dense padded scratch.
    #      Zero only the 1-pixel border; interior is fully overwritten below.
    zrow = jnp.zeros((1, ka + kb), jnp.bfloat16)
    xp_ref[0:1, :] = zrow
    xp_ref[h2 + 1:h2 + 2, :] = zrow
    zca = jnp.zeros((h2, c2), jnp.bfloat16)
    xp_ref[1:h2 + 1, 0:c2] = zca
    xp_ref[1:h2 + 1, (w2 + 1) * c2:ka] = zca
    if zero_full_x1:
        # F.pad offsets mean x1_up does not fill the whole interior -> zero it.
        xp_ref[1:h2 + 1, ka:ka + kb] = jnp.zeros((h2, kb), jnp.bfloat16)
    else:
        zcb = jnp.zeros((h2, c1), jnp.bfloat16)
        xp_ref[1:h2 + 1, ka:ka + c1] = zcb
        xp_ref[1:h2 + 1, ka + (w2 + 1) * c1:ka + kb] = zcb

    xp_ref[1:h2 + 1, c2:c2 + w2 * c2] = x2_ref[0]                 # concat part 1
    r0 = ka + (1 + px0) * c1
    xp_ref[1 + py0:1 + py0 + h2u, r0:r0 + w2u * c1] = x1_up       # concat part 2

    # ---- conv1 (+folded BN) + ReLU: three lane-dense GEMMs (one per ky).
    acc = (jnp.dot(xp_ref[0:h2, :], wt1_ref[0], preferred_element_type=jnp.float32)
           + jnp.dot(xp_ref[1:h2 + 1, :], wt1_ref[1], preferred_element_type=jnp.float32)
           + jnp.dot(xp_ref[2:h2 + 2, :], wt1_ref[2], preferred_element_type=jnp.float32))
    y1 = jnp.maximum(acc + b1_ref[...], 0.0)                      # (h2, w2*cout) f32

    # ---- pad conv1 output (border-only zero) and run conv2 the same way.
    zrow2 = jnp.zeros((1, (w2 + 2) * cout), jnp.bfloat16)
    y1p_ref[0:1, :] = zrow2
    y1p_ref[h2 + 1:h2 + 2, :] = zrow2
    zcc = jnp.zeros((h2, cout), jnp.bfloat16)
    y1p_ref[1:h2 + 1, 0:cout] = zcc
    y1p_ref[1:h2 + 1, (w2 + 1) * cout:(w2 + 2) * cout] = zcc
    y1p_ref[1:h2 + 1, cout:(w2 + 1) * cout] = y1.astype(jnp.bfloat16)

    acc2 = (jnp.dot(y1p_ref[0:h2, :], wt2_ref[0], preferred_element_type=jnp.float32)
            + jnp.dot(y1p_ref[1:h2 + 1, :], wt2_ref[1], preferred_element_type=jnp.float32)
            + jnp.dot(y1p_ref[2:h2 + 2, :], wt2_ref[2], preferred_element_type=jnp.float32))
    y2 = jnp.maximum(acc2 + b2_ref[...], 0.0)

    # lane-dense store: last dim = w2*cout (multiple of 128 at these sizes)
    o_ref[0] = y2.astype(o_ref.dtype)


# ----------------------------- Up module wrapper -----------------------------

def init_up_params(key, in_channels, out_channels):
    """Deterministic synthetic parameters for DoubleIGConv (two conv+BN+ReLU)."""
    ks = jax.random.split(key, 8)
    eps = 1e-5

    def conv_bn(kw, kb, kg, kbt, cin, cout):
        w = jax.random.normal(kw, (3, 3, cin, cout), jnp.float32) * \
            (2.0 / (9 * cin)) ** 0.5
        b = 0.01 * jax.random.normal(kb, (cout,), jnp.float32)
        gamma = 1.0 + 0.1 * jax.random.normal(kg, (cout,), jnp.float32)
        beta = 0.1 * jax.random.normal(kbt, (cout,), jnp.float32)
        scale = gamma / jnp.sqrt(1.0 + eps)       # inference BN: mean=0, var=1
        bias = beta + b * scale
        return w, scale, bias

    w1, s1, b1 = conv_bn(ks[0], ks[1], ks[2], ks[3], in_channels, out_channels)
    w2, s2, b2 = conv_bn(ks[4], ks[5], ks[6], ks[7], out_channels, out_channels)
    return dict(w1=w1, scale1=s1, bias1=b1, w2=w2, scale2=s2, bias2=b2)


def up_forward(x1_nchw, x2_nchw, params, *, nchw_output=True):
    """Pallas implementation of Up.forward. Inputs are NCHW (PyTorch); output
    is bf16 (NCHW by default, NHWC if nchw_output=False to skip a transpose)."""
    n, c1, h1, w1 = x1_nchw.shape
    n2, c2, h2, w2 = x2_nchw.shape
    assert n == n2
    h2u, w2u = 2 * h1, 2 * w1
    diff_y, diff_x = h2 - h2u, w2 - w2u
    # TODO(synk): PyTorch F.pad with negative pads crops; not handled here.
    assert diff_y >= 0 and diff_x >= 0, (diff_y, diff_x)
    py0, px0 = diff_y // 2, diff_x // 2
    cin = c1 + c2
    cout = params["w1"].shape[-1]
    assert cin == params["w1"].shape[2]

    # bf16 BEFORE the layout transpose (halves HBM traffic of the transposes);
    # activations presented lane-dense as (H, W*C).
    x1_flat = jnp.transpose(x1_nchw.astype(jnp.bfloat16), (0, 2, 3, 1)) \
                 .reshape(n, h1, w1 * c1)
    x2_flat = jnp.transpose(x2_nchw.astype(jnp.bfloat16), (0, 2, 3, 1)) \
                 .reshape(n, h2, w2 * c2)

    # Separable bilinear upsample operators: H-pass matrix + kron'd W-pass.
    mh = _interp_matrix(h1, h2u).astype(jnp.bfloat16)                         # (h2u, h1)
    mw = _interp_matrix(w1, w2u)                                              # (w2u, w1)
    kw = jnp.kron(mw.T, jnp.eye(c1, dtype=jnp.float32)).astype(jnp.bfloat16)  # (w1*c1, w2u*c1)

    # Fold BN scale into conv weights, then build block-banded GEMM weights.
    # conv1's K rows are split [x2-region | x1-region] so the channel concat
    # (torch.cat([x2, x1], dim=1)) is fused into the weight layout.
    w1f = params["w1"] * params["scale1"]
    w2f = params["w2"] * params["scale2"]
    wt1 = jnp.stack([
        jnp.concatenate([_band_weight(w1f[ky, :, :c2, :], w2, c2, cout),
                         _band_weight(w1f[ky, :, c2:, :], w2, c1, cout)], axis=0)
        for ky in range(3)]).astype(jnp.bfloat16)          # (3, (w2+2)*cin, w2*cout)
    wt2 = jnp.stack([_band_weight(w2f[ky], w2, cout, cout)
                     for ky in range(3)]).astype(jnp.bfloat16)  # (3, (w2+2)*cout, w2*cout)

    b1 = jnp.tile(params["bias1"].astype(jnp.float32), w2).reshape(1, w2 * cout)
    b2 = jnp.tile(params["bias2"].astype(jnp.float32), w2).reshape(1, w2 * cout)

    kernel = functools.partial(
        _up_fused_kernel,
        h2=h2, w2=w2, c1=c1, c2=c2, cout=cout,
        h2u=h2u, w2u=w2u, py0=py0, px0=px0,
        zero_full_x1=(diff_y > 0 or diff_x > 0),
    )

    out = pl.pallas_call(
        kernel,
        out_shape=jax.ShapeDtypeStruct((n, h2, w2 * cout), jnp.bfloat16),
        grid=(n,),
        in_specs=[
            pl.BlockSpec((1, h1, w1 * c1), lambda i: (i, 0, 0)),
            pl.BlockSpec((1, h2, w2 * c2), lambda i: (i, 0, 0)),
            pl.BlockSpec((h2u, h1), lambda i: (0, 0)),
            pl.BlockSpec((w1 * c1, w2u * c1), lambda i: (0, 0)),
            pl.BlockSpec((3, (w2 + 2) * cin, w2 * cout), lambda i: (0, 0, 0)),
            pl.BlockSpec((1, w2 * cout), lambda i: (0, 0)),
            pl.BlockSpec((3, (w2 + 2) * cout, w2 * cout), lambda i: (0, 0, 0)),
            pl.BlockSpec((1, w2 * cout), lambda i: (0, 0)),
        ],
        out_specs=pl.BlockSpec((1, h2, w2 * cout), lambda i: (i, 0, 0)),
        scratch_shapes=[
            pltpu.VMEM((h2 + 2, (w2 + 2) * cin), jnp.bfloat16),   # padded [x2 | x1_up]
            pltpu.VMEM((h2 + 2, (w2 + 2) * cout), jnp.bfloat16),  # padded conv1 output
        ],
        compiler_params=pltpu.CompilerParams(
            dimension_semantics=("parallel",),
            vmem_limit_bytes=32 * 1024 * 1024,
        ),
    )(x1_flat, x2_flat, mh, kw, wt1, b1, wt2, b2)

    out = out.reshape(n, h2, w2, cout)
    if nchw_output:
        out = jnp.transpose(out, (0, 3, 1, 2))   # bf16 transpose -> NCHW
    return out


# ----------------------------- pure-JAX reference ----------------------------
# Mirrors the same numeric recipe (bf16 operands, f32 accumulation/epilogues).

def up_forward_ref(x1_nchw, x2_nchw, params):
    x1 = jnp.transpose(x1_nchw, (0, 2, 3, 1)).astype(jnp.bfloat16)
    x2 = jnp.transpose(x2_nchw, (0, 2, 3, 1)).astype(jnp.bfloat16)
    n, h1, w1, c1 = x1.shape
    _, h2, w2, c2 = x2.shape
    mh = _interp_matrix(h1, 2 * h1).astype(jnp.bfloat16)
    mw = _interp_matrix(w1, 2 * w1).astype(jnp.bfloat16)
    u = jnp.einsum("ph,nhwc->npwc", mh, x1,
                   preferred_element_type=jnp.float32).astype(jnp.bfloat16)
    x1u = jnp.einsum("qw,npwc->npqc", mw, u,
                     preferred_element_type=jnp.float32).astype(jnp.bfloat16)
    diff_y = h2 - x1u.shape[1]
    diff_x = w2 - x1u.shape[2]
    x1u = jnp.pad(x1u, ((0, 0),
                        (diff_y // 2, diff_y - diff_y // 2),
                        (diff_x // 2, diff_x - diff_x // 2),
                        (0, 0)))
    x = jnp.concatenate([x2, x1u], axis=-1)            # torch.cat([x2, x1], dim=1)
    w1f = (params["w1"] * params["scale1"]).astype(jnp.bfloat16)
    w2f = (params["w2"] * params["scale2"]).astype(jnp.bfloat16)
    y = lax.conv_general_dilated(x, w1f, (1, 1), ((1, 1), (1, 1)),
                                 dimension_numbers=("NHWC", "HWIO", "NHWC"),
                                 preferred_element_type=jnp.float32)
    y = jnp.maximum(y + params["bias1"], 0.0).astype(jnp.bfloat16)
    y = lax.conv_general_dilated(y, w2f, (1, 1), ((1, 1), (1, 1)),
                                 dimension_numbers=("NHWC", "HWIO", "NHWC"),
                                 preferred_element_type=jnp.float32)
    y = jnp.maximum(y + params["bias2"], 0.0)
    return jnp.transpose(y, (0, 3, 1, 2))


# ----------------------------- main ------------------------------------------

if __name__ == "__main__":
    key = jax.random.PRNGKey(0)
    k_x1, k_x2, k_p = jax.random.split(key, 3)

    batch = 2
    in_channels, out_channels = 8, 16       # DoubleIGConv(in_channels, out_channels)
    h1 = w1 = 8                             # x1 spatial; x2 is 2x larger

    # PyTorch NCHW inputs: x1 and x2 each carry in_channels//2 channels
    x1 = jax.random.normal(k_x1, (batch, in_channels // 2, h1, w1), jnp.float32)
    x2 = jax.random.normal(k_x2, (batch, in_channels // 2, 2 * h1, 2 * w1),
                           jnp.float32)

    params = init_up_params(k_p, in_channels, out_channels)

    out = up_forward(x1, x2, params)
    jax.block_until_ready(out)

    assert out.shape == (batch, out_channels, 2 * h1, 2 * w1), out.shape

    ref = up_forward_ref(x1, x2, params)
    out_f32 = out.astype(jnp.float32)
    max_err = float(jnp.max(jnp.abs(out_f32 - ref)))
    # tolerance covers bf16 ulp effects at the mirrored cast points + bf16 output
    assert jnp.allclose(out_f32, ref, atol=5e-2, rtol=5e-2), max_err

    print("KERNEL_OK")
</pallas_src>

<mosaic_0001>
module attributes {stable_mosaic.version = 11 : i64} {
  func.func @_up_fused_kernel(%arg0: i32, %arg1: memref<1x8x32xbf16, #tpu.memory_space<vmem>>, %arg2: memref<1x16x64xbf16, #tpu.memory_space<vmem>>, %arg3: memref<16x8xbf16, #tpu.memory_space<vmem>>, %arg4: memref<32x64xbf16, #tpu.memory_space<vmem>>, %arg5: memref<3x144x256xbf16, #tpu.memory_space<vmem>>, %arg6: memref<1x256xf32, #tpu.memory_space<vmem>>, %arg7: memref<3x288x256xbf16, #tpu.memory_space<vmem>>, %arg8: memref<1x256xf32, #tpu.memory_space<vmem>>, %arg9: memref<1x16x256xbf16, #tpu.memory_space<vmem>>, %arg10: memref<18x144xbf16, #tpu.memory_space<vmem>>, %arg11: memref<18x288xbf16, #tpu.memory_space<vmem>>) attributes {dimension_semantics = [#tpu.dimension_semantics<parallel>], iteration_bounds = array<i64: 2>, scalar_prefetch = 0 : i64, scratch_operands = 2 : i64, tpu.core_type = #tpu.core_type<tc>, window_params = [{transform_indices = @transform_0, window_bounds = array<i64: 1, 8, 32>}, {transform_indices = @transform_1, window_bounds = array<i64: 1, 16, 64>}, {pipeline_mode = #tpu.pipeline_mode<synchronous>, transform_indices = @transform_2, window_bounds = array<i64: 16, 8>}, {pipeline_mode = #tpu.pipeline_mode<synchronous>, transform_indices = @transform_3, window_bounds = array<i64: 32, 64>}, {pipeline_mode = #tpu.pipeline_mode<synchronous>, transform_indices = @transform_4, window_bounds = array<i64: 3, 144, 256>}, {pipeline_mode = #tpu.pipeline_mode<synchronous>, transform_indices = @transform_5, window_bounds = array<i64: 1, 256>}, {pipeline_mode = #tpu.pipeline_mode<synchronous>, transform_indices = @transform_6, window_bounds = array<i64: 3, 288, 256>}, {pipeline_mode = #tpu.pipeline_mode<synchronous>, transform_indices = @transform_7, window_bounds = array<i64: 1, 256>}, {transform_indices = @transform_8, window_bounds = array<i64: 1, 16, 256>}]} {
    %c0 = arith.constant 0 : index
    %c0_0 = arith.constant 0 : index
    %0 = vector.load %arg3[%c0, %c0_0] : memref<16x8xbf16, #tpu.memory_space<vmem>>, vector<16x8xbf16>
    %c0_1 = arith.constant 0 : index
    %c0_2 = arith.constant 0 : index
    %c0_3 = arith.constant 0 : index
    %1 = vector.load %arg1[%c0_1, %c0_2, %c0_3] : memref<1x8x32xbf16, #tpu.memory_space<vmem>>, vector<1x8x32xbf16>
    %2 = vector.shape_cast %1 : vector<1x8x32xbf16> to vector<8x32xbf16>
    %cst = arith.constant dense<0.000000e+00> : vector<16x32xf32>
    %3 = tpu.matmul %0, %2, %cst {dimension_numbers = #tpu.dot_dimension_numbers<[1], [0], [0], [1], [0, 0, 1, 1], [], []>} : vector<16x8xbf16>, vector<8x32xbf16>, vector<16x32xf32> -> vector<16x32xf32>
    %4 = arith.truncf %3 : vector<16x32xf32> to vector<16x32xbf16>
    %c0_4 = arith.constant 0 : index
    %c0_5 = arith.constant 0 : index
    %5 = vector.load %arg4[%c0_4, %c0_5] : memref<32x64xbf16, #tpu.memory_space<vmem>>, vector<32x64xbf16>
    %cst_6 = arith.constant dense<0.000000e+00> : vector<16x64xf32>
    %6 = tpu.matmul %4, %5, %cst_6 {dimension_numbers = #tpu.dot_dimension_numbers<[1], [0], [0], [1], [0, 0, 1, 1], [], []>} : vector<16x32xbf16>, vector<32x64xbf16>, vector<16x64xf32> -> vector<16x64xf32>
    %7 = arith.truncf %6 : vector<16x64xf32> to vector<16x64xbf16>
    %cst_7 = arith.constant 0.000000e+00 : bf16
    %8 = vector.broadcast %cst_7 : bf16 to vector<1x144xbf16>
    %c0_8 = arith.constant 0 : index
    %c0_9 = arith.constant 0 : index
    %9 = vector.load %arg10[%c0_8, %c0_9] : memref<18x144xbf16, #tpu.memory_space<vmem>>, vector<1x144xbf16>
    tpu.vector_store %arg10[%c0_8, %c0_9], %8 {strides = array<i32>} : memref<18x144xbf16, #tpu.memory_space<vmem>>, vector<1x144xbf16>,
    %c17 = arith.constant 17 : index
    %c0_10 = arith.constant 0 : index
    %10 = vector.load %arg10[%c17, %c0_10] : memref<18x144xbf16, #tpu.memory_space<vmem>>, vector<1x144xbf16>
    tpu.vector_store %arg10[%c17, %c0_10], %8 {strides = array<i32>} : memref<18x144xbf16, #tpu.memory_space<vmem>>, vector<1x144xbf16>,
    %cst_11 = arith.constant 0.000000e+00 : bf16
    %11 = vector.broadcast %cst_11 : bf16 to vector<16x4xbf16>
    %c1 = arith.constant 1 : index
    %c0_12 = arith.constant 0 : index
    %12 = vector.load %arg10[%c1, %c0_12] : memref<18x144xbf16, #tpu.memory_space<vmem>>, vector<16x4xbf16>
    tpu.vector_store %arg10[%c1, %c0_12], %11 {strides = array<i32>} : memref<18x144xbf16, #tpu.memory_space<vmem>>, vector<16x4xbf16>,
    %c1_13 = arith.constant 1 : index
    %c68 = arith.constant 68 : index
    %13 = vector.load %arg10[%c1_13, %c68] : memref<18x144xbf16, #tpu.memory_space<vmem>>, vector<16x4xbf16>
    tpu.vector_store %arg10[%c1_13, %c68], %11 {strides = array<i32>} : memref<18x144xbf16, #tpu.memory_space<vmem>>, vector<16x4xbf16>,
    %cst_14 = arith.constant 0.000000e+00 : bf16
    %14 = vector.broadcast %cst_14 : bf16 to vector<16x4xbf16>
    %c1_15 = arith.constant 1 : index
    %c72 = arith.constant 72 : index
    %15 = vector.load %arg10[%c1_15, %c72] : memref<18x144xbf16, #tpu.memory_space<vmem>>, vector<16x4xbf16>
    tpu.vector_store %arg10[%c1_15, %c72], %14 {strides = array<i32>} : memref<18x144xbf16, #tpu.memory_space<vmem>>, vector<16x4xbf16>,
    %c1_16 = arith.constant 1 : index
    %c140 = arith.constant 140 : index
    %16 = vector.load %arg10[%c1_16, %c140] : memref<18x144xbf16, #tpu.memory_space<vmem>>, vector<16x4xbf16>
    tpu.vector_store %arg10[%c1_16, %c140], %14 {strides = array<i32>} : memref<18x144xbf16, #tpu.memory_space<vmem>>, vector<16x4xbf16>,
    %c0_17 = arith.constant 0 : index
    %c0_18 = arith.constant 0 : index
    %c0_19 = arith.constant 0 : index
    %17 = vector.load %arg2[%c0_17, %c0_18, %c0_19] : memref<1x16x64xbf16, #tpu.memory_space<vmem>>, vector<1x16x64xbf16>
    %18 = vector.shape_cast %17 : vector<1x16x64xbf16> to vector<16x64xbf16>
    %c1_20 = arith.constant 1 : index
    %c4 = arith.constant 4 : index
    %19 = vector.load %arg10[%c1_20, %c4] : memref<18x144xbf16, #tpu.memory_space<vmem>>, vector<16x64xbf16>
    tpu.vector_store %arg10[%c1_20, %c4], %18 {strides = array<i32>} : memref<18x144xbf16, #tpu.memory_space<vmem>>, vector<16x64xbf16>,
    %c1_21 = arith.constant 1 : index
    %c76 = arith.constant 76 : index
    %20 = vector.load %arg10[%c1_21, %c76] : memref<18x144xbf16, #tpu.memory_space<vmem>>, vector<16x64xbf16>
    tpu.vector_store %arg10[%c1_21, %c76], %7 {strides = array<i32>} : memref<18x144xbf16, #tpu.memory_space<vmem>>, vector<16x64xbf16>,
    %c0_22 = arith.constant 0 : index
    %c0_23 = arith.constant 0 : index
    %21 = vector.load %arg10[%c0_22, %c0_23] : memref<18x144xbf16, #tpu.memory_space<vmem>>, vector<16x144xbf16>
    %c0_24 = arith.constant 0 : index
    %c0_25 = arith.constant 0 : index
    %c0_26 = arith.constant 0 : index
    %22 = vector.load %arg5[%c0_24, %c0_25, %c0_26] : memref<3x144x256xbf16, #tpu.memory_space<vmem>>, vector<1x144x256xbf16>
    %23 = vector.shape_cast %22 : vector<1x144x256xbf16> to vector<144x256xbf16>
    %cst_27 = arith.constant dense<0.000000e+00> : vector<16x256xf32>
    %24 = tpu.matmul %21, %23, %cst_27 {dimension_numbers = #tpu.dot_dimension_numbers<[1], [0], [0], [1], [0, 0, 1, 1], [], []>} : vector<16x144xbf16>, vector<144x256xbf16>, vector<16x256xf32> -> vector<16x256xf32>
    %c1_28 = arith.constant 1 : index
    %c0_29 = arith.constant 0 : index
    %25 = vector.load %arg10[%c1_28, %c0_29] : memref<18x144xbf16, #tpu.memory_space<vmem>>, vector<16x144xbf16>
    %c1_30 = arith.constant 1 : index
    %c0_31 = arith.constant 0 : index
    %c0_32 = arith.constant 0 : index
    %26 = vector.load %arg5[%c1_30, %c0_31, %c0_32] : memref<3x144x256xbf16, #tpu.memory_space<vmem>>, vector<1x144x256xbf16>
    %27 = vector.shape_cast %26 : vector<1x144x256xbf16> to vector<144x256xbf16>
    %cst_33 = arith.constant dense<0.000000e+00> : vector<16x256xf32>
    %28 = tpu.matmul %25, %27, %cst_33 {dimension_numbers = #tpu.dot_dimension_numbers<[1], [0], [0], [1], [0, 0, 1, 1], [], []>} : vector<16x144xbf16>, vector<144x256xbf16>, vector<16x256xf32> -> vector<16x256xf32>
    %29 = arith.addf %24, %28 : vector<16x256xf32>
    %c2 = arith.constant 2 : index
    %c0_34 = arith.constant 0 : index
    %30 = vector.load %arg10[%c2, %c0_34] : memref<18x144xbf16, #tpu.memory_space<vmem>>, vector<16x144xbf16>
    %c2_35 = arith.constant 2 : index
    %c0_36 = arith.constant 0 : index
    %c0_37 = arith.constant 0 : index
    %31 = vector.load %arg5[%c2_35, %c0_36, %c0_37] : memref<3x144x256xbf16, #tpu.memory_space<vmem>>, vector<1x144x256xbf16>
    %32 = vector.shape_cast %31 : vector<1x144x256xbf16> to vector<144x256xbf16>
    %cst_38 = arith.constant dense<0.000000e+00> : vector<16x256xf32>
    %33 = tpu.matmul %30, %32, %cst_38 {dimension_numbers = #tpu.dot_dimension_numbers<[1], [0], [0], [1], [0, 0, 1, 1], [], []>} : vector<16x144xbf16>, vector<144x256xbf16>, vector<16x256xf32> -> vector<16x256xf32>
    %34 = arith.addf %29, %33 : vector<16x256xf32>
    %c0_39 = arith.constant 0 : index
    %c0_40 = arith.constant 0 : index
    %35 = vector.load %arg6[%c0_39, %c0_40] : memref<1x256xf32, #tpu.memory_space<vmem>>, vector<1x256xf32>
    %36 = vector.broadcast %35 : vector<1x256xf32> to vector<16x256xf32>
    %37 = arith.addf %34, %36 : vector<16x256xf32>
    %cst_41 = arith.constant 0.000000e+00 : f32
    %38 = vector.broadcast %cst_41 : f32 to vector<16x256xf32>
    %39 = arith.maximumf %37, %38 : vector<16x256xf32>
    %cst_42 = arith.constant 0.000000e+00 : bf16
    %40 = vector.broadcast %cst_42 : bf16 to vector<1x288xbf16>
    %c0_43 = arith.constant 0 : index
    %c0_44 = arith.constant 0 : index
    %41 = vector.load %arg11[%c0_43, %c0_44] : memref<18x288xbf16, #tpu.memory_space<vmem>>, vector<1x288xbf16>
    tpu.vector_store %arg11[%c0_43, %c0_44], %40 {strides = array<i32>} : memref<18x288xbf16, #tpu.memory_space<vmem>>, vector<1x288xbf16>,
    %c17_45 = arith.constant 17 : index
    %c0_46 = arith.constant 0 : index
    %42 = vector.load %arg11[%c17_45, %c0_46] : memref<18x288xbf16, #tpu.memory_space<vmem>>, vector<1x288xbf16>
    tpu.vector_store %arg11[%c17_45, %c0_46], %40 {strides = array<i32>} : memref<18x288xbf16, #tpu.memory_space<vmem>>, vector<1x288xbf16>,
    %cst_47 = arith.constant 0.000000e+00 : bf16
    %43 = vector.broadcast %cst_47 : bf16 to vector<16x16xbf16>
    %c1_48 = arith.constant 1 : index
    %c0_49 = arith.constant 0 : index
    %44 = vector.load %arg11[%c1_48, %c0_49] : memref<18x288xbf16, #tpu.memory_space<vmem>>, vector<16x16xbf16>
    tpu.vector_store %arg11[%c1_48, %c0_49], %43 {strides = array<i32>} : memref<18x288xbf16, #tpu.memory_space<vmem>>, vector<16x16xbf16>,
    %c1_50 = arith.constant 1 : index
    %c272 = arith.constant 272 : index
    %45 = vector.load %arg11[%c1_50, %c272] : memref<18x288xbf16, #tpu.memory_space<vmem>>, vector<16x16xbf16>
    tpu.vector_store %arg11[%c1_50, %c272], %43 {strides = array<i32>} : memref<18x288xbf16, #tpu.memory_space<vmem>>, vector<16x16xbf16>,
    %46 = arith.truncf %39 : vector<16x256xf32> to vector<16x256xbf16>
    %c1_51 = arith.constant 1 : index
    %c16 = arith.constant 16 : index
    %47 = vector.load %arg11[%c1_51, %c16] : memref<18x288xbf16, #tpu.memory_space<vmem>>, vector<16x256xbf16>
    tpu.vector_store %arg11[%c1_51, %c16], %46 {strides = array<i32>} : memref<18x288xbf16, #tpu.memory_space<vmem>>, vector<16x256xbf16>,
    %c0_52 = arith.constant 0 : index
    %c0_53 = arith.constant 0 : index
    %48 = vector.load %arg11[%c0_52, %c0_53] : memref<18x288xbf16, #tpu.memory_space<vmem>>, vector<16x288xbf16>
    %c0_54 = arith.constant 0 : index
    %c0_55 = arith.constant 0 : index
    %c0_56 = arith.constant 0 : index
    %49 = vector.load %arg7[%c0_54, %c0_55, %c0_56] : memref<3x288x256xbf16, #tpu.memory_space<vmem>>, vector<1x288x256xbf16>
    %50 = vector.shape_cast %49 : vector<1x288x256xbf16> to vector<288x256xbf16>
    %cst_57 = arith.constant dense<0.000000e+00> : vector<16x256xf32>
    %51 = tpu.matmul %48, %50, %cst_57 {dimension_numbers = #tpu.dot_dimension_numbers<[1], [0], [0], [1], [0, 0, 1, 1], [], []>} : vector<16x288xbf16>, vector<288x256xbf16>, vector<16x256xf32> -> vector<16x256xf32>
    %c1_58 = arith.constant 1 : index
    %c0_59 = arith.constant 0 : index
    %52 = vector.load %arg11[%c1_58, %c0_59] : memref<18x288xbf16, #tpu.memory_space<vmem>>, vector<16x288xbf16>
    %c1_60 = arith.constant 1 : index
    %c0_61 = arith.constant 0 : index
    %c0_62 = arith.constant 0 : index
    %53 = vector.load %arg7[%c1_60, %c0_61, %c0_62] : memref<3x288x256xbf16, #tpu.memory_space<vmem>>, vector<1x288x256xbf16>
    %54 = vector.shape_cast %53 : vector<1x288x256xbf16> to vector<288x256xbf16>
    %cst_63 = arith.constant dense<0.000000e+00> : vector<16x256xf32>
    %55 = tpu.matmul %52, %54, %cst_63 {dimension_numbers = #tpu.dot_dimension_numbers<[1], [0], [0], [1], [0, 0, 1, 1], [], []>} : vector<16x288xbf16>, vector<288x256xbf16>, vector<16x256xf32> -> vector<16x256xf32>
    %56 = arith.addf %51, %55 : vector<16x256xf32>
    %c2_64 = arith.constant 2 : index
    %c0_65 = arith.constant 0 : index
    %57 = vector.load %arg11[%c2_64, %c0_65] : memref<18x288xbf16, #tpu.memory_space<vmem>>, vector<16x288xbf16>
    %c2_66 = arith.constant 2 : index
    %c0_67 = arith.constant 0 : index
    %c0_68 = arith.constant 0 : index
    %58 = vector.load %arg7[%c2_66, %c0_67, %c0_68] : memref<3x288x256xbf16, #tpu.memory_space<vmem>>, vector<1x288x256xbf16>
    %59 = vector.shape_cast %58 : vector<1x288x256xbf16> to vector<288x256xbf16>
    %cst_69 = arith.constant dense<0.000000e+00> : vector<16x256xf32>
    %60 = tpu.matmul %57, %59, %cst_69 {dimension_numbers = #tpu.dot_dimension_numbers<[1], [0], [0], [1], [0, 0, 1, 1], [], []>} : vector<16x288xbf16>, vector<288x256xbf16>, vector<16x256xf32> -> vector<16x256xf32>
    %61 = arith.addf %56, %60 : vector<16x256xf32>
    %c0_70 = arith.constant 0 : index
    %c0_71 = arith.constant 0 : index
    %62 = vector.load %arg8[%c0_70, %c0_71] : memref<1x256xf32, #tpu.memory_space<vmem>>, vector<1x256xf32>
    %63 = vector.broadcast %62 : vector<1x256xf32> to vector<16x256xf32>
    %64 = arith.addf %61, %63 : vector<16x256xf32>
    %cst_72 = arith.constant 0.000000e+00 : f32
    %65 = vector.broadcast %cst_72 : f32 to vector<16x256xf32>
    %66 = arith.maximumf %64, %65 : vector<16x256xf32>
    %67 = arith.truncf %66 : vector<16x256xf32> to vector<16x256xbf16>
    %c0_73 = arith.constant 0 : index
    %c0_74 = arith.constant 0 : index
    %c0_75 = arith.constant 0 : index
    %68 = vector.load %arg9[%c0_73, %c0_74, %c0_75] : memref<1x16x256xbf16, #tpu.memory_space<vmem>>, vector<1x16x256xbf16>
    %69 = vector.shape_cast %68 : vector<1x16x256xbf16> to vector<16x256xbf16>
    %70 = vector.shape_cast %67 : vector<16x256xbf16> to vector<1x16x256xbf16>
    tpu.vector_store %arg9[%c0_73, %c0_74, %c0_75], %70 {strides = array<i32>} : memref<1x16x256xbf16, #tpu.memory_space<vmem>>, vector<1x16x256xbf16>,
    return
  }
  func.func @transform_0(%arg0: i32) -> (i32, i32, i32) {
    %c0_i32 = arith.constant 0 : i32
    %c0_i32_0 = arith.constant 0 : i32
    %c0_i32_1 = arith.constant 0 : i32
    return %arg0, %c0_i32, %c0_i32_0 : i32, i32, i32
  }
  func.func @transform_1(%arg0: i32) -> (i32, i32, i32) {
    %c0_i32 = arith.constant 0 : i32
    %c0_i32_0 = arith.constant 0 : i32
    %c0_i32_1 = arith.constant 0 : i32
    return %arg0, %c0_i32, %c0_i32_0 : i32, i32, i32
  }
  func.func @transform_2(%arg0: i32) -> (i32, i32) {
    %c0_i32 = arith.constant 0 : i32
    %c0_i32_0 = arith.constant 0 : i32
    %c0_i32_1 = arith.constant 0 : i32
    return %c0_i32, %c0_i32_0 : i32, i32
  }
  func.func @transform_3(%arg0: i32) -> (i32, i32) {
    %c0_i32 = arith.constant 0 : i32
    %c0_i32_0 = arith.constant 0 : i32
    %c0_i32_1 = arith.constant 0 : i32
    return %c0_i32, %c0_i32_0 : i32, i32
  }
  func.func @transform_4(%arg0: i32) -> (i32, i32, i32) {
    %c0_i32 = arith.constant 0 : i32
    %c0_i32_0 = arith.constant 0 : i32
    %c0_i32_1 = arith.constant 0 : i32
    %c0_i32_2 = arith.constant 0 : i32
    return %c0_i32, %c0_i32_0, %c0_i32_1 : i32, i32, i32
  }
  func.func @transform_5(%arg0: i32) -> (i32, i32) {
    %c0_i32 = arith.constant 0 : i32
    %c0_i32_0 = arith.constant 0 : i32
    %c0_i32_1 = arith.constant 0 : i32
    return %c0_i32, %c0_i32_0 : i32, i32
  }
  func.func @transform_6(%arg0: i32) -> (i32, i32, i32) {
    %c0_i32 = arith.constant 0 : i32
    %c0_i32_0 = arith.constant 0 : i32
    %c0_i32_1 = arith.constant 0 : i32
    %c0_i32_2 = arith.constant 0 : i32
    return %c0_i32, %c0_i32_0, %c0_i32_1 : i32, i32, i32
  }
  func.func @transform_7(%arg0: i32) -> (i32, i32) {
    %c0_i32 = arith.constant 0 : i32
    %c0_i32_0 = arith.constant 0 : i32
    %c0_i32_1 = arith.constant 0 : i32
    return %c0_i32, %c0_i32_0 : i32, i32
  }
  func.func @transform_8(%arg0: i32) -> (i32, i32, i32) {
    %c0_i32 = arith.constant 0 : i32
    %c0_i32_0 = arith.constant 0 : i32
    %c0_i32_1 = arith.constant 0 : i32
    return %arg0, %c0_i32, %c0_i32_0 : i32, i32, i32
  }
}

</mosaic_0001>

<bundles_post_ra>
// kernel: tpu_custom_call.1
= control target key start
LH: loop header
LB: loop body
LE: loop exit
PB: predicated region body
PF: predicated region fallthrough
CT: control target
= control target key end

     0   :  { %s4145_s0 = inlined_call_operand.vmem [shape: bf16[2,8,32], index: 0, kind: input, shape index: {}]   ;;  %s4146_s1 = inlined_call_operand.hbm [shape: bf16[2,16,64], index: 1, kind: input, shape index: {}]   ;;  %s4147_s2 = inlined_call_operand.vmem [shape: bf16[16,8], index: 2, kind: input, shape index: {}]   ;;  %s4148_s3 = inlined_call_operand.hbm [shape: bf16[32,64], index: 3, kind: input, shape index: {}]   ;;  %s4149_s4 = inlined_call_operand.hbm [shape: bf16[3,144,256], index: 4, kind: input, shape index: {}]   ;;  %s4150_s5 = inlined_call_operand.vmem [shape: f32[1,256], index: 5, kind: input, shape index: {}]   ;;  %s4151_s6 = inlined_call_operand.hbm [shape: bf16[3,288,256], index: 6, kind: input, shape index: {}]   ;;  %s4152_s7 = inlined_call_operand.vmem [shape: f32[1,256], index: 7, kind: input, shape index: {}]   ;;  %s4153_s8 = inlined_call_operand.hbm [shape: bf16[2,16,256], index: 8, kind: output, shape index: {}]  }
   0x1   :  { %4157 = sst [smem:[#allocation17_spill]] %s4148_s3 }
   0x2   :  { %4158 = sst [smem:[#allocation18_spill]] %s4149_s4 }
   0x3   :  { %13 = vsyncpa [#allocation5], 0 }
   0x4   :  { %15 = vsyncpa [#allocation5 + $0x1], 0 }
   0x5   :  { %16 = vsyncpa [#allocation8], 0 }
   0x6   :  { %17 = vsyncpa [#allocation11], 0 }
   0x7   :  { %18 = vsyncpa [#allocation6], 0 }
   0x8   :  { %20 = vsyncpa [#allocation6 + $0x1], 0  ;;  %s3660_s27 = smov 0   ;;  %s3662_s28 = smov 0  }
   0x9   :  { %s3664_s29 = smov 0   ;;  %s3666_s30 = smov 0  }
   0xa LB: > { %s3681_s9 = sadd.s32 4294967295, %s3600_s30   ;;  %s2457_s10 = sadd.s32 4294967294, %s3600_s30   ;;  %s3600_s30 = sphi %s3666_s30, %s4211_s30   ;;  %s3596_s29 = sphi %s3664_s29, %s4210_s29   ;;  %s3592_s28 = sphi %s3662_s28, %s4209_s28   ;;  %s3588_s27 = sphi %s3660_s27, %s4208_s27  }
   0xb   : > { %p72_p0 = scmp.ne.s32.totalorder %s3592_s28, %s3588_s27  ;;  %p73_p1 = scmp.eq.s32.totalorder %s3681_s9, 0 }
   0xc   : > { %p222_p2 = scmp.eq.s32.totalorder %s3681_s9, 1  ;;  %p228_p3 = scmp.eq.s32.totalorder %s2457_s10, 1 }
   0xd   : > { %p3690_p4 = por %p73_p1, %p72_p0  ;;  %p2458_p5 = scmp.ge.s32.totalorder %s3600_s30, 1 }
   0xe   : > { %p3695_p6 = por %p228_p3, %p72_p0  ;;  %p235_p7 = scmp.lt.s32.totalorder %s3600_s30, 3 }
   0xf   : > { %s4161_s3 = sld [smem:[#allocation17_spill]]  ;;  %s3602_s17 = smov [#allocation7]  }
  0x10   : > { %p3703_p8 = pnand %p2458_p5, %p235_p7  ;;  %s251_s18 = sshll.u32 %s3602_s17, 4  ;;  %s252_s18 = int_to_ptr.vmem [resolvable:$true] %s251_s18 }
  0x11   : > { %s4164_s4 = sld [smem:[#allocation18_spill]]  ;;  %s4154_s23 = smov 64  }
  0x12   : > { %p3335_p9 = pneg %p3703_p8  ;;  %s4155_s24 = smov 4  }
  0x13   : > { %s3605_s25 = smov [#allocation9]   ;;  %s3606_s10 = smov 128  }
  0x14   : > { %p3711_p10 = pnand %p3335_p9, %p73_p1  ;;  %s265_s26 = sshll.u32 %s3605_s25, 4  ;;  %s266_s26 = int_to_ptr.vmem [resolvable:$true] %s265_s26 }
  0x15   : > { %s249_s15 = sshll.u32 %s4161_s3, 4  ;;  %s3607_s13 = smov 8   ;;  %s250_s15 = int_to_ptr.hbm [resolvable:$true] %s249_s15 }
  0x16   : > { %3338 = dma.hbm_to_vmem [thread:$0]  (!%p3711_p10), %s250_s15, 256, %s252_s18, [#allocation8], %s4154_s23, %s4154_s23, %s4155_s24  }
  0x17   : > { %s263_s22 = sshll.u32 %s4164_s4, 4  ;;  %s280_s20 = sshll.u32 %s4151_s6, 4  ;;  %s264_s22 = int_to_ptr.hbm [resolvable:$true] %s263_s22  ;;  %s281_s20 = int_to_ptr.hbm [resolvable:$true] %s280_s20 }
  0x18   : > { %3341 = dma.hbm_to_vmem [thread:$0]  (!%p3711_p10), %s264_s22, 6912, %s266_s26, [#allocation8], %s3606_s10, %s3606_s10, %s3607_s13  }
  0x19   : > { %s3608_s15 = smov [#allocation10]   ;;  %s3732_s21 = sadd.s32 1, %s3600_s30  }
  0x1a   : > { %s282_s18 = sshll.u32 %s3608_s15, 4  ;;  %s56_s25 = ssub.s32 %s3600_s30, %s3732_s21  ;;  %s283_s18 = int_to_ptr.vmem [resolvable:$true] %s282_s18 }
  0x1b   : > { %3344 = dma.hbm_to_vmem [thread:$0]  (!%p3711_p10), %s281_s20, 13824, %s283_s18, [#allocation11], %s3606_s10, %s3606_s10, %s3607_s13  }
  0x1c   : > { %s59_s23 = sadd.s32 1, %s3596_s29  ;;  %p57_p12 = scmp.eq.s32.totalorder %s56_s25, 0 }
  0x1d   : > { %p66_p13 = scmp.ne.s32.totalorder %s3596_s29, %s3592_s28  ;;  %p67_p0 = scmp.eq.s32.totalorder %s3600_s30, 0 }
  0x1e   : > { %s3741_s22 = scalar_select %p57_p12, %s3596_s29, %s59_s23  }
  0x1f   : > { %p3745_p3 = por %p222_p2, %p66_p13  ;;  %p3356_p5 = scmp.lt.s32.totalorder %s3600_s30, 2 }
  0x20   : > { %s306_s14 = sand.u32 1, %s3596_s29   ;;  %s3152_s17 = sshll.u32 %s3600_s30, 3 }
  0x21   : > { %p68_p7 = por %p67_p0, %p66_p13  ;;  %s2463_s19 = sshll.u32 %s306_s14, 3 }
  0x22   : > { %s315_s20 = scalar_lea.hbm %s4146_s1, %s3152_s17  ;;  %s310_s18 = scalar_lea.vmem [#allocation4], %s2463_s19 }
  0x23   : > { %s316_s15 = sshll.u32 %s315_s20, 4  ;;  %s318_s25 = sshll.u32 %s310_s18, 4  ;;  %s317_s15 = int_to_ptr.hbm [resolvable:$true] %s316_s15  ;;  %s319_s25 = int_to_ptr.vmem [resolvable:$true] %s318_s25 }
  0x24   : > { %p3755_p9 = pnand %p3356_p5, %p68_p7  ;;  %s307_s24 = scalar_lea.sflag [#allocation5], %s306_s14 }
  0x25   : > { %s3496_s3 = sshra.s32 %s317_s15, 4  ;;  %s3503_s19 = scalar_lea.hbm %s4146_s1, 16  ;;  %s3497_s3 = int_to_ptr.hbm [resolvable:$true] %s3496_s3 }
  0x26   : > { %s3498_s4 = scalar_lea.hbm %s3497_s3, 8  ;;  %p3500_p10 = pneg %p3755_p9 }
  0x27   : > { %p3499_p2 = scmp.ne.s32.totalorder %s3497_s3, %s3498_s4  ;;  %p3504_p0 = scmp.lt.s32.totalorder %s3497_s3, %s4146_s1 }
  0x28   : > { %p3505_p5 = scmp.lt.s32.totalorder %s3503_s19, %s3498_s4 }
  0x29   : > { %p3501_p12 = pnand %p3500_p10, %p3499_p2 }
  0x2a   : > { %p3506_p7 = por %p3505_p5, %p3504_p0 }
  0x2b   : > { %p3502_p13 = pneg %p3501_p12 }
  0x2d   : > { %p3507_p11 = pnand %p3506_p7, %p3502_p13 }
  0x2f   : > { %3510 = shalt.err (!%p3507_p11)
}
  0x30   : > { %s4167_s14 = smov 4   ;;  %s4168_s18 = smov 64  }
  0x31   : > { %3348 = dma.hbm_to_vmem [thread:$0]  (!%p3755_p9), %s317_s15, 128, %s319_s25, %s307_s24, %s4168_s18, %s4168_s18, %s4167_s14  }
  0x32   : > { %330 = sbr.rel (%p3703_p8) target bundleno = 1080 (0x438), region = 52  ;;  %s3775_s17 = sand.u32 (!%p3703_p8), 1, %s3592_s28  }
  0x33   : > { %s2467_s3 = sshll.u32 (!%p3703_p8), %s3775_s17, 3  ;;  %s333_s4 = scalar_lea.sflag (!%p3703_p8), [#allocation5], %s3775_s17 }
  0x34   : > { %s336_s10 = scalar_lea.vmem (!%p3703_p8), [#allocation4], %s2467_s3 }
  0x37   : > { %3571 = dma.done.wait (%p3690_p4), %s333_s4, 128  }
  0x38   : > { %3573 = vsyncadd (%p3690_p4), %s333_s4, 4294967168 }
  0x39   : > { %3575 = dma.done.wait (%p73_p1), [#allocation8], 7168  }
  0x3a   : > { %3577 = vsyncadd (%p73_p1), [#allocation8], 4294960128 }
  0x3b   : > { %3579 = dma.done.wait (%p73_p1), [#allocation11], 13824  }
  0x3c   : > { %3581 = vsyncadd (%p73_p1), [#allocation11], 4294953472  ;;  %p389_p8 = scmp.lt.s32.totalorder %s3681_s9, 1  ;;  %vm406_vm0 = vcmask 1043456   ;;  %v3153_v2 = vld [vmem:[%s4147_s2] sm:$0xff]  ;;  %vm402_vm1 = vcmask 64512  }
  0x3d   : > { %v3155_v3 = vld [vmem:[#allocation7 + $0x8] sm:$0xff]  ;;  %v3154_v4 = vld [vmem:[#allocation7] sm:$0xff]  ;;  %v527_v5 = vld [vmem:[%s336_s10] sm:$0xf]  ;;  %s3609_s13 = smov 4   ;;  %vm4156_vm2 = vcmask 261120  }
  0x3e   : > { %s390_s16 = scalar_select %p389_p8, %s3681_s9, 1  ;;  %451 = vmatpush.bf16.msra.mxu1 %v3155_v3  ;;  %v3799_v6 = vld [vmem:[%s336_s10 + $0x4] sm:$0xf]  ;;  %v532_v7 = vshrl.u32 %v527_v5, 16  ;;  %v535_v8 = vshll.u32 %v527_v5, 16  ;;  %vm461_vm4 = vcmask 1040384  }
  0x3f   : > { %v540_v10 = vshrl.u32 %v3799_v6, 16  ;;  %vm462_vm3 = vsmask.f32 256  ;;  %vm465_vm5 = vsmask.f32 4352  ;;  %vm464_vm7 = vcmask 126980  }
  0x40   : > { %s2472_s24 = sshll.u32 %s390_s16, 2  ;;  %v3801_v9 = vrot.slane %v532_v7, 7  ;;  %vm3812_vm6 = vmand %vm461_vm4, %vm462_vm3  ;;  %v468_v18 = vld [vmem:[#allocation2] sm:$0x11]  ;;  %vm479_vm10 = vcmask 27648   ;;  %s3610_s20 = smov 76  }
  0x41   : > { %s392_s25 = scalar_lea.vmem %s4145_s0, %s2472_s24  ;;  %v3806_v12 = vrot.slane %v540_v10, 7  ;;  %vm466_vm8 = vmand %vm464_vm7, %vm465_vm5  ;;  %vm471_vm11 = vsmask.f32 7938  ;;  %vm473_vm14 = vsmask.f32 7954  ;;  %v543_v41 = vshll.u32 %v3799_v6, 16 }
  0x42   : > { %v396_v0 = vld [vmem:[%s392_s25] sm:$0xf]  ;;  %452 = vmatpush.bf16.msra.mxu1 %v3154_v4  ;;  %v537_v11 = vor.u32 %v535_v8, %v3801_v9  ;;  %vm467_vm9 = vmor %vm466_vm8, %vm3812_vm6  ;;  %v476_v24 = vld [vmem:[#allocation2 + $0x10] sm:$0x11]  ;;  %vm522_vm8 = vcmask 122976   ;;  %v538_v50 = vrot.slane %v3801_v9, 4 }
  0x43   : > { %v408_v1 = vsel %vm406_vm0, %v396_v0, 0  ;;  %v547_v13 = vrot.slane %v3806_v12, 4  ;;  %v469_v19 = vsel %vm467_vm9, 0, %v468_v18  ;;  %vm480_vm12 = vmand %vm479_vm10, %vm471_vm11  ;;  %vm529_vm9 = vsmask.f32 4368  ;;  %s3612_s3 = smov 16  }
  0x44   : > { %417 = vmatpush.bf16.msra.mxu0 %v408_v1  ;;  %548 = vrot.lane.b32.xlu0 %v537_v11, %s3609_s13  ;;  %470 = vst [vmem:[#allocation2] sm:$0x11] %v469_v19  ;;  %vm3822_vm13 = vmand %vm461_vm4, %vm471_vm11  ;;  %vm491_vm4 = vcmask 585248   ;;  %v545_v51 = vor.u32 %v543_v41, %v3806_v12  ;;  %v2545_v1 = vld [vmem:[#allocation9 + $0x100] sm:$0xf]  ;;  %s2471_s16 = sshll.u32 %s3775_s17, 4 }
  0x45   : > { %vm474_vm15 = vmand %vm464_vm7, %vm473_vm14  ;;  %v2537_v4 = vld [vmem:[#allocation9 + $0xf0] sm:$0xf]  ;;  %v3187_v5 = vld [vmem:[#allocation9 + $0xf4] sm:$0xf0]  ;;  %s3318_s24 = sshll.u32 %s3681_s9, 4  ;;  %s388_s23 = scalar_lea.vmem [#allocation12], %s2471_s16 }
  0x46   : > { %vm475_vm0 = vmor %vm474_vm15, %vm3822_vm13  ;;  %v2619_v6 = vld [vmem:[#allocation9 + $0x70] sm:$0xf]  ;;  %v2538_v7 = vor.u32 %v3187_v5, %v2537_v4  ;;  %v3171_v8 = vld [vmem:[#allocation9 + $0x74] sm:$0xf0]  ;;  %s2339_s25 = scalar_lea.hbm %s4153_s8, %s3318_s24  ;;  %s2340_s19 = sshll.u32 %s388_s23, 4  ;;  %s2341_s19 = int_to_ptr.vmem [resolvable:$true] %s2340_s19 }
  0x47   : > { %2477 = vmatmul.msk.bf16.vlgmr.msra.gmra.mxu0 %vm402_vm1, %v3153_v2  ;;  %v477_v28 = vsel %vm475_vm0, 0, %v476_v24  ;;  %vm486_vm1 = vcmask 24576   ;;  %vm3835_vm15 = vmand %vm522_vm8, %vm462_vm3  ;;  %v3189_v2 = vld [vmem:[#allocation9 + $0x104] sm:$0xf0]  ;;  %v2529_v9 = vld [vmem:[#allocation9 + $0xe0] sm:$0xf]  ;;  %v2620_v11 = vor.u32 %v3171_v8, %v2619_v6 }
  0x48   : > { %478 = vst [vmem:[#allocation2 + $0x10] sm:$0x11] %v477_v28  ;;  %vm3830_vm7 = vmand %vm486_vm1, %vm462_vm3  ;;  %vm498_vm1 = vcmask 582176   ;;  %v2546_v3 = vor.u32 %v3189_v2, %v2545_v1  ;;  %v3185_v10 = vld [vmem:[#allocation9 + $0xe4] sm:$0xf0]  ;;  %s2328_s9 = scalar_lea.sflag [#allocation6], %s3775_s17 }
  0x49   : > { %vm3842_vm0 = vmor %vm462_vm3, %vm529_vm9  ;;  %v2611_v12 = vld [vmem:[#allocation9 + $0x60] sm:$0xf]  ;;  %944 = vmatpush.bf16.msrb.mxu1 %v2620_v11  ;;  %v2521_v18 = vld [vmem:[#allocation9 + $0xd0] sm:$0xf]  ;;  %s3546_s4 = scalar_lea.hbm %s4153_s8, 32 }
  0x4a   : > { %vm499_vm8 = vmand %vm498_vm1, %vm462_vm3  ;;  %v546_v52 = vsel %vm3842_vm0, %v538_v50, %v545_v51  ;;  %795 = vmatpush.bf16.msra.mxu2 %v2546_v3  ;;  %v3183_v19 = vld [vmem:[#allocation9 + $0xd4] sm:$0xf0]  ;;  %v2547_v24 = vld [vmem:[#allocation9 + $0x108] sm:$0xf0] }
  0x4b   : > { %v481_v27 = vld [vmem:[#allocation2] sm:$0xf]  ;;  %v2539_v33 = vld [vmem:[#allocation9 + $0xf8] sm:$0xf0]  ;;  %v2595_v35 = vld [vmem:[#allocation9 + $0x40] sm:$0xf] }
  0x4c   : > { %552 = vrot.lane.b32.xlu0 %v547_v13, %s3609_s13  ;;  %v482_v29 = vsel %vm480_vm12, 0, %v481_v27  ;;  %vm492_vm12 = vmand %vm491_vm4, %vm471_vm11  ;;  %v3169_v13 = vld [vmem:[#allocation9 + $0x64] sm:$0xf0]  ;;  %v3167_v27 = vld [vmem:[#allocation9 + $0x54] sm:$0xf0] }
  0x4d   : > { %483 = vst [vmem:[#allocation2] sm:$0xf] %v482_v29  ;;  %v2513_v29 = vld [vmem:[#allocation9 + $0xc0] sm:$0xf]  ;;  %v3184_v41 = vld [vmem:[#allocation9 + $0xe4] sm:$0xf] }
  0x4e   : > { %796 = vmatpush.bf16.msra.mxu2 %v2538_v7  ;;  %v3177_v50 = vld [vmem:[#allocation9 + $0xa4] sm:$0xf0]  ;;  %v3170_v1 = vld [vmem:[#allocation9 + $0x74] sm:$0xf]  ;;  %v2621_v2 = vld [vmem:[#allocation9 + $0x78] sm:$0xf0] }
  0x4f   : > { %v488_v38 = vld [vmem:[#allocation2 + $0x10] sm:$0x1]  ;;  %v524_v39 = vld [vmem:[#allocation2 + $0x14] sm:$0x1]  ;;  %v2624_v5 = vor.u32 %v3170_v1, %v2621_v2  ;;  %v2571_v6 = vld [vmem:[#allocation9 + $0x10] sm:$0xf] }
  0x50   : > { %v489_v43 = vsel %vm3830_vm7, 0, %v488_v38  ;;  %v525_v44 = vsel %vm3835_vm15, 0, %v524_v39  ;;  %vm503_vm7 = vcmask 618048   ;;  %vm510_vm15 = vcmask 614976   ;;  %v2505_v38 = vld [vmem:[#allocation9 + $0xb0] sm:$0xf] }
  0x51   : > { %490 = vst [vmem:[#allocation2 + $0x10] sm:$0x1] %v489_v43  ;;  %vm504_vm9 = vmand %vm503_vm7, %vm471_vm11  ;;  %v3179_v39 = vld [vmem:[#allocation9 + $0xb4] sm:$0xf0]  ;;  %v2531_v43 = vld [vmem:[#allocation9 + $0xe8] sm:$0xf0] }
  0x52   : > { %526 = vst [vmem:[#allocation2 + $0x14] sm:$0x1] %v525_v44  ;;  %v2534_v44 = vor.u32 %v3184_v41, %v2531_v43  ;;  %v3159_v7 = vld [vmem:[#allocation9 + $0x14] sm:$0xf0]  ;;  %v3178_v8 = vld [vmem:[#allocation9 + $0xb4] sm:$0xf] }
  0x53   : > { %v2507_v11 = vld [vmem:[#allocation9 + $0xb8] sm:$0xf0]  ;;  %v3172_v43 = vld [vmem:[#allocation9 + $0x84] sm:$0xf]  ;;  %v3190_v2 = vld [vmem:[#allocation9 + $0x114] sm:$0xf] }
  0x54   : > { %v493_v42 = vld [vmem:[#allocation2] sm:$0xf] }
  0x55   : > { %v494_v48 = vsel %vm492_vm12, 0, %v493_v42  ;;  %vm557_vm12 = vcmask 551968   ;;  %v2506_v42 = vor.u32 %v3179_v39, %v2505_v38  ;;  %v2597_v38 = vld [vmem:[#allocation9 + $0x48] sm:$0xf0] }
  0x56   : > { %495 = vst [vmem:[#allocation2] sm:$0xf] %v494_v48  ;;  %vm558_vm1 = vmand %vm557_vm12, %vm471_vm11  ;;  %v3611_v48 = vmov 0  }
  0x57   : > { %485 = vst.msk [vmem:[#allocation2 + $0x8] sm:$0xf] %vm479_vm10, %v3611_v48  ;;  %vm595_vm10 = vcmask 621568  }
  0x58   : > { %v500_v53 = vld [vmem:[#allocation2 + $0x10] sm:$0x1]  ;;  %497 = vst.msk [vmem:[#allocation2 + $0x8] sm:$0xf] %vm491_vm4, %v3611_v48 }
  0x59   : > { %v501_v55 = vsel %vm499_vm8, 0, %v500_v53  ;;  %vm564_vm8 = vcmask 548896   ;;  %v2523_v53 = vld [vmem:[#allocation9 + $0xd8] sm:$0xf0]  ;;  %509 = vst.msk [vmem:[#allocation2 + $0x8] sm:$0xf] %vm503_vm7, %v3611_v48 }
  0x5a   : > { %502 = vst [vmem:[#allocation2 + $0x10] sm:$0x1] %v501_v55  ;;  %vm602_vm7 = vcmask 1044064  }
  0x5d   : > { %v505_v54 = vld [vmem:[#allocation2] sm:$0xf] }
  0x5e   : > { %v506_v56 = vsel %vm504_vm9, 0, %v505_v54  ;;  %vm565_vm9 = vmand %vm564_vm8, %vm462_vm3  ;;  %vm616_vm8 = vcmask 94212   ;;  %v2581_v54 = vld [vmem:[#allocation9 + $0x28] sm:$0xf0] }
  0x5f   : > { %507 = vst [vmem:[#allocation2] sm:$0xf] %v506_v56  ;;  %v2579_v56 = vld [vmem:[#allocation9 + $0x20] sm:$0xf] }
  0x61   : > { %v512_v58 = vld [vmem:[#allocation2 + $0x10] sm:$0x1] }
  0x66   : > { %v559_v59 = vld [vmem:[#allocation2] sm:$0xf] }
  0xb6   : > { %v549_v57 = vpop.permute.xlu0 %548 }
  0xb7   : > { %v560_v61 = vsel %vm558_vm1, %v549_v57, %v559_v59  ;;  %vm614_vm1 = vcmask 1040992   ;;  %v3161_v57 = vld [vmem:[#allocation9 + $0x24] sm:$0xf0] }
  0xb8   : > { %561 = vst [vmem:[#allocation2] sm:$0xf] %v560_v61  ;;  %v2580_v59 = vor.u32 %v3161_v57, %v2579_v56  ;;  %v3175_v61 = vld [vmem:[#allocation9 + $0x94] sm:$0xf0] }
  0xbe   : > { %v553_v62 = vpop.permute.xlu0 %552 }
  0xc4   : > { %v419_v14 = vpop.f32.mrf.mxu0 }
  0xcc   : > { %v421_v15 = vpop.f32.mrf.mxu0 }
  0xcd   : > { %v424_v16 = vpack.c.bf16 %v421_v15, %v419_v14  ;;  %v2530_v14 = vor.u32 %v3185_v10, %v2529_v9  ;;  %v517_v15 = vld [vmem:[#allocation2 + $0x4] sm:$0xf]  ;;  %v2572_v10 = vor.u32 %v3159_v7, %v2571_v6  ;;  %v2565_v6 = vld [vmem:[#allocation9 + $0x8] sm:$0xf0] }
  0xcf   : > { %2486 = vmatmul.msk.bf16.vlgmr.msra.gmra.mxu1 %vm4156_vm2, %v424_v16  ;;  %vm511_vm2 = vmand %vm510_vm15, %vm462_vm3  ;;  %v2612_v16 = vor.u32 %v3169_v13, %v2611_v12  ;;  %797 = vmatpush.bf16.msra.mxu2 %v2530_v14  ;;  %v3168_v12 = vld [vmem:[#allocation9 + $0x64] sm:$0xf]  ;;  %v2613_v13 = vld [vmem:[#allocation9 + $0x68] sm:$0xf0] }
  0xd0   : > { %v513_v60 = vsel %vm511_vm2, 0, %v512_v58  ;;  %vm515_vm2 = vcmask 126048   ;;  %v3208_v58 = vld [vmem:[#allocation9 + $0x1a4] sm:$0xf] }
  0xd1   : > { %514 = vst [vmem:[#allocation2 + $0x10] sm:$0x1] %v513_v60  ;;  %vm516_vm15 = vmand %vm515_vm2, %vm471_vm11  ;;  %945 = vmatpush.bf16.msrb.mxu1 %v2612_v16  ;;  %v2489_v60 = vld [vmem:[#allocation9 + $0x90] sm:$0xf]  ;;  %v2616_v16 = vor.u32 %v3168_v12, %v2613_v13 }
  0xd2   : > { %521 = vst.msk [vmem:[#allocation2 + $0xc] sm:$0xf] %vm515_vm2, %v3611_v48  ;;  %vm604_vm2 = vcmask 97284  }
  0xd8   : > { %v566_v63 = vld [vmem:[#allocation2 + $0x10] sm:$0x1] }
  0xd9   : > { %v567_v0 = vsel %vm565_vm9, %v553_v62, %v566_v63  ;;  %vm3872_vm9 = vmand %vm614_vm1, %vm462_vm3  ;;  %v3180_v62 = vld [vmem:[#allocation9 + $0xc4] sm:$0xf]  ;;  %v2490_v63 = vor.u32 %v3175_v61, %v2489_v60  ;;  %v3158_v61 = vld [vmem:[#allocation9 + $0x14] sm:$0xf] }
  0xda   : > { %568 = vst [vmem:[#allocation2 + $0x10] sm:$0x1] %v567_v0  ;;  %v2515_v0 = vld [vmem:[#allocation9 + $0xc8] sm:$0xf0]  ;;  %vm3894_vm1 = vmand %vm602_vm7, %vm471_vm11 }
  0xdb   : > { %v2518_v4 = vor.u32 %v3180_v62, %v2515_v0  ;;  %v2573_v62 = vld [vmem:[#allocation9 + $0x18] sm:$0xf0] }
  0xe1   : > { %v619_v3 = vld [vmem:[#allocation2 + $0x10] sm:$0x11] }
 0x14c   : > { %v454_v20 = vpop.f32.mrf.mxu1 }
 0x14d   : > { %v459_v21 = vpack.c.bf16 %v454_v20, %v454_v20  ;;  %v518_v20 = vsel %vm516_vm15, 0, %v517_v15  ;;  %vm3880_vm15 = vmand %vm616_vm8, %vm465_vm5  ;;  %v2510_v15 = vor.u32 %v3178_v8, %v2507_v11 }
 0x14e   : > { %519 = vst [vmem:[#allocation2 + $0x4] sm:$0xf] %v518_v20  ;;  %vm618_vm4 = vmor %vm3880_vm15, %vm3872_vm9  ;;  %vm791_vm15 = vcmask 130048  }
 0x14f   : > { %v570_v23 = vshrl.u32 %v459_v21, 16  ;;  %v573_v26 = vshll.u32 %v459_v21, 16  ;;  %v2522_v21 = vor.u32 %v3183_v19, %v2521_v18  ;;  %v2563_v18 = vld [vmem:[#allocation9] sm:$0xf]  ;;  %v3157_v19 = vld [vmem:[#allocation9 + $0x4] sm:$0xf0]  ;;  %vm612_vm9 = vmor %vm604_vm2, %vm602_vm7 }
 0x150   : > { %v2564_v20 = vor.u32 %v3157_v19, %v2563_v18  ;;  %vm1200_vm7 = vcmask 1044484  }
 0x151   : > { %v572_v25 = vrot.slane %v570_v23, 7  ;;  %v3188_v23 = vld [vmem:[#allocation9 + $0x104] sm:$0xf]  ;;  %798 = vmatpush.bf16.msra.mxu2 %v2522_v21 }
 0x152   : > { %v3176_v21 = vld [vmem:[#allocation9 + $0xa4] sm:$0xf] }
 0x153   : > { %v575_v30 = vor.u32 %v573_v26, %v572_v25  ;;  %v576_v45 = vrot.slane %v572_v25, 4  ;;  %v2550_v25 = vor.u32 %v3188_v23, %v2547_v24  ;;  %v2603_v26 = vld [vmem:[#allocation9 + $0x50] sm:$0xf]  ;;  %v2499_v23 = vld [vmem:[#allocation9 + $0xa8] sm:$0xf0] }
 0x154   : > { %v456_v31 = vpop.f32.mrf.mxu1  ;;  %v2604_v28 = vor.u32 %v3167_v27, %v2603_v26  ;;  %v2502_v26 = vor.u32 %v3176_v21, %v2499_v23  ;;  %v3166_v27 = vld [vmem:[#allocation9 + $0x54] sm:$0xf] }
 0x155   : > { %v460_v32 = vpack.c.bf16 %v456_v31, %v456_v31  ;;  %586 = vrot.lane.b32.xlu1 %v575_v30, %s3610_s20  ;;  %823 = vmatpush.bf16.msrb.mxu0 %v2550_v25  ;;  %v3181_v30 = vld [vmem:[#allocation9 + $0xc4] sm:$0xf0] }
 0x156   : > { %946 = vmatpush.bf16.msrb.mxu1 %v2604_v28  ;;  %v2514_v31 = vor.u32 %v3181_v30, %v2513_v29  ;;  %v2605_v28 = vld [vmem:[#allocation9 + $0x58] sm:$0xf0] }
 0x157   : > { %v578_v34 = vshrl.u32 %v460_v32, 16  ;;  %v581_v37 = vshll.u32 %v460_v32, 16  ;;  %v3186_v32 = vld [vmem:[#allocation9 + $0xf4] sm:$0xf]  ;;  %v2608_v29 = vor.u32 %v3166_v27, %v2605_v28  ;;  %v2695_v28 = vld [vmem:[#allocation9 + $0x198] sm:$0xf0] }
 0x158   : > { %799 = vmatpush.bf16.msra.mxu2 %v2514_v31  ;;  %v2553_v31 = vld [vmem:[#allocation9 + $0x110] sm:$0xf]  ;;  %v3206_v27 = vld [vmem:[#allocation9 + $0x194] sm:$0xf] }
 0x159   : > { %v580_v36 = vrot.slane %v578_v34, 7  ;;  %v2542_v34 = vor.u32 %v3186_v32, %v2539_v33  ;;  %v3191_v32 = vld [vmem:[#allocation9 + $0x114] sm:$0xf0] }
 0x15a   : > { %v2554_v33 = vor.u32 %v3191_v32, %v2553_v31 }
 0x15b   : > { %v583_v46 = vor.u32 %v581_v37, %v580_v36  ;;  %v585_v47 = vrot.slane %v580_v36, 4  ;;  %v3165_v36 = vld [vmem:[#allocation9 + $0x44] sm:$0xf0]  ;;  %824 = vmatpush.bf16.msrb.mxu0 %v2542_v34  ;;  %v3174_v34 = vld [vmem:[#allocation9 + $0x94] sm:$0xf] }
 0x15c   : > { %v2596_v37 = vor.u32 %v3165_v36, %v2595_v35  ;;  %800 = vmatpush.bf16.msra.mxu2 %v2506_v42  ;;  %v2491_v35 = vld [vmem:[#allocation9 + $0x98] sm:$0xf0]  ;;  %v3164_v36 = vld [vmem:[#allocation9 + $0x44] sm:$0xf]  ;;  %816 = vmatpush.bf16.msra.mxu3 %v2554_v33  ;;  %v2698_v42 = vor.u32 %v3206_v27, %v2695_v28  ;;  %v2661_v28 = vld [vmem:[#allocation9 + $0x150] sm:$0xf] }
 0x15d   : > { %590 = vrot.lane.b32.xlu2 %v585_v47, %s3610_s20  ;;  %v584_v49 = vsel %vm3842_vm0, %v576_v45, %v583_v46  ;;  %v2587_v45 = vld [vmem:[#allocation9 + $0x30] sm:$0xf]  ;;  %v3163_v46 = vld [vmem:[#allocation9 + $0x34] sm:$0xf0]  ;;  %v2600_v39 = vor.u32 %v3164_v36, %v2597_v38 }
 0x15e   : > { %588 = vrot.lane.b32.xlu1 %v584_v49, %s3610_s20  ;;  %947 = vmatpush.bf16.msrb.mxu1 %v2596_v37  ;;  %v2588_v47 = vor.u32 %v3163_v46, %v2587_v45  ;;  %v2497_v49 = vld [vmem:[#allocation9 + $0xa0] sm:$0xf]  ;;  %v2494_v37 = vor.u32 %v3174_v34, %v2491_v35  ;;  %v3162_v46 = vld [vmem:[#allocation9 + $0x34] sm:$0xf] }
 0x15f   : > { %825 = vmatpush.bf16.msrb.mxu0 %v2534_v44  ;;  %v2498_v51 = vor.u32 %v3177_v50, %v2497_v49  ;;  %v2629_v44 = vld [vmem:[#allocation9 + $0x88] sm:$0xf0] }
 0x160   : > { %v2632_v45 = vor.u32 %v3172_v43, %v2629_v44 }
 0x161   : > { %801 = vmatpush.bf16.msra.mxu2 %v2498_v51  ;;  %v607_v51 = vld [vmem:[#allocation2] sm:$0xff] }
 0x162   : > { %948 = vmatpush.bf16.msrb.mxu1 %v2588_v47  ;;  %v2589_v47 = vld [vmem:[#allocation9 + $0x38] sm:$0xf0] }
 0x163   : > { %v2592_v50 = vor.u32 %v3162_v46, %v2589_v47  ;;  %v3204_v46 = vld [vmem:[#allocation9 + $0x184] sm:$0xf]  ;;  %v2687_v47 = vld [vmem:[#allocation9 + $0x188] sm:$0xf0] }
 0x165   : > { %550 = vrot.lane.b32.xlu2 %v546_v52, %s3609_s13  ;;  %v3182_v52 = vld [vmem:[#allocation9 + $0xd4] sm:$0xf]  ;;  %802 = vmatpush.bf16.msra.mxu2 %v2490_v63  ;;  %v2576_v63 = vor.u32 %v3158_v61, %v2573_v62  ;;  %v3207_v61 = vld [vmem:[#allocation9 + $0x194] sm:$0xf0]  ;;  %s2342_s13 = sshll.u32 %s2339_s25, 4  ;;  %s2343_s13 = int_to_ptr.hbm [resolvable:$true] %s2342_s13 }
 0x166   : > { %v2526_v55 = vor.u32 %v3182_v52, %v2523_v53  ;;  %949 = vmatpush.bf16.msrb.mxu1 %v2580_v59  ;;  %v3160_v53 = vld [vmem:[#allocation9 + $0x24] sm:$0xf]  ;;  %v2703_v59 = vld [vmem:[#allocation9 + $0x1a8] sm:$0xf0]  ;;  %v3198_v62 = vld [vmem:[#allocation9 + $0x154] sm:$0xf] }
 0x167   : > { %v2584_v56 = vor.u32 %v3160_v53, %v2581_v54  ;;  %v2706_v60 = vor.u32 %v3208_v58, %v2703_v59  ;;  %s3540_s20 = sshra.s32 %s2343_s13, 4  ;;  %s3541_s20 = int_to_ptr.hbm [resolvable:$true] %s3540_s20 }
 0x168   : > { %826 = vmatpush.bf16.msrb.mxu0 %v2526_v55  ;;  %s3542_s14 = scalar_lea.hbm %s3541_s20, 16  ;;  %p3547_p9 = scmp.lt.s32.totalorder %s3541_s20, %s4153_s8 }
 0x169   : > { %972 = vmatpush.bf16.msrb.mxu2 %v2624_v5  ;;  %v3156_v5 = vld [vmem:[#allocation9 + $0x4] sm:$0xf]  ;;  %p3543_p1 = scmp.ne.s32.totalorder %s3541_s20, %s3542_s14  ;;  %p3548_p2 = scmp.lt.s32.totalorder %s3546_s4, %s3542_s14 }
 0x16a   : > { %950 = vmatpush.bf16.msrb.mxu1 %v2572_v10  ;;  %v2568_v8 = vor.u32 %v3156_v5, %v2565_v6  ;;  %v2655_v5 = vld [vmem:[#allocation9 + $0x148] sm:$0xf0] }
 0x16b   : > { %p3544_p4 = pnand %p3543_p1, %p3745_p3  ;;  %p3549_p10 = por %p3548_p2, %p3547_p9 }
 0x16c   : > { %827 = vmatpush.bf16.msrb.mxu0 %v2518_v4 }
 0x16d   : > { %973 = vmatpush.bf16.msrb.mxu2 %v2616_v16  ;;  %p3545_p11 = pneg %p3544_p4 }
 0x16e   : > { %951 = vmatpush.bf16.msrb.mxu1 %v2564_v20 }
 0x16f   : > { %p3550_p12 = pnand %p3549_p10, %p3545_p11 }
 0x170   : > { %828 = vmatpush.bf16.msrb.mxu0 %v2510_v15 }
 0x171   : > { %974 = vmatpush.bf16.msrb.mxu2 %v2608_v29  ;;  %v2627_v29 = vld [vmem:[#allocation9 + $0x80] sm:$0xf] }
 0x172   : > { %1175 = vmatpush.bf16.msra.mxu1 %v2706_v60  ;;  %v2693_v60 = vld [vmem:[#allocation9 + $0x190] sm:$0xf] }
 0x174   : > { %829 = vmatpush.bf16.msrb.mxu0 %v2502_v26 }
 0x175   : > { %975 = vmatpush.bf16.msrb.mxu2 %v2600_v39 }
 0x178   : > { %830 = vmatpush.bf16.msrb.mxu0 %v2494_v37 }
 0x179   : > { %976 = vmatpush.bf16.msrb.mxu2 %v2592_v50  ;;  %v2690_v50 = vor.u32 %v3204_v46, %v2687_v47 }
 0x17c   : > { %993 = vmatpush.bf16.msra.mxu0 %v2632_v45 }
 0x17d   : > { %977 = vmatpush.bf16.msrb.mxu2 %v2584_v56  ;;  %v3200_v56 = vld [vmem:[#allocation9 + $0x164] sm:$0xf] }
 0x181   : > { %978 = vmatpush.bf16.msrb.mxu2 %v2576_v63  ;;  %v2663_v63 = vld [vmem:[#allocation9 + $0x158] sm:$0xf0] }
 0x185   : > { %979 = vmatpush.bf16.msrb.mxu2 %v2568_v8  ;;  %v2677_v8 = vld [vmem:[#allocation9 + $0x170] sm:$0xf] }
 0x1b7   : > { %v591_v9 = vpop.permute.xlu2 %590 }
 0x1b8   : > { %v594_v14 = vrot.slane %v591_v9, 4 }
 0x1ba   : > { %v598_v24 = vsel %vm595_vm10, %v594_v14, %v591_v9 }
 0x1bb   : > { %v620_v25 = vsel %vm618_vm4, %v598_v24, %v619_v3  ;;  %v2555_v3 = vld [vmem:[#allocation9 + $0x118] sm:$0xf0]  ;;  %vm1025_vm4 = vcmask 1046528  }
 0x1bc   : > { %621 = vst [vmem:[#allocation2 + $0x10] sm:$0x11] %v620_v25  ;;  %v2558_v4 = vor.u32 %v3190_v2, %v2555_v3  ;;  %v2685_v2 = vld [vmem:[#allocation9 + $0x180] sm:$0xf]  ;;  %v3205_v3 = vld [vmem:[#allocation9 + $0x184] sm:$0xf0] }
 0x1bd   : > { %v2686_v6 = vor.u32 %v3205_v3, %v2685_v2 }
 0x1be   : > { %844 = vmatpush.bf16.msrb.mxu3 %v2558_v4  ;;  %v3196_v4 = vld [vmem:[#allocation9 + $0x144] sm:$0xf] }
 0x1bf   : > { %v551_v30 = vpop.permute.xlu2 %550 }
 0x1c0   : > { %563 = vst.msk [vmem:[#allocation2 + $0x8] sm:$0xf] %vm557_vm12, %v551_v30  ;;  %vm3900_vm12 = vmand %vm604_vm2, %vm473_vm14  ;;  %v3173_v30 = vld [vmem:[#allocation9 + $0x84] sm:$0xf0] }
 0x1c1   : > { %vm606_vm8 = vmor %vm3900_vm12, %vm3894_vm1  ;;  %v2628_v41 = vor.u32 %v3173_v30, %v2627_v29  ;;  %v3199_v29 = vld [vmem:[#allocation9 + $0x154] sm:$0xf0]  ;;  %vm1206_vm12 = vcmask 253952  }
 0x1c2   : > { %vm3949_vm2 = vmand %vm1200_vm7, %vm465_vm5 }
 0x1c3   : > { %v642_v9 = vld [vmem:[#allocation2 + $0x10] sm:$0x11]  ;;  %vm1202_vm1 = vmor %vm3949_vm2, %vm3812_vm6 }
 0x1c4   : > { %v669_v10 = vunpack.c.l.b16 %v642_v9  ;;  %v670_v11 = vunpack.c.h.b16 %v642_v9  ;;  %v3203_v9 = vld [vmem:[#allocation9 + $0x174] sm:$0xf0]  ;;  %vm1216_vm6 = vmand %vm1206_vm12, %vm471_vm11 }
 0x1c6   : > { %v3914_v13 = vpack.c.b16 %v669_v10, %v669_v10  ;;  %v674_v14 = vpack.c.b16 %v670_v11, %v670_v11  ;;  %v3194_v10 = vld [vmem:[#allocation9 + $0x134] sm:$0xf]  ;;  %v2647_v11 = vld [vmem:[#allocation9 + $0x138] sm:$0xf0] }
 0x1c7   : > { %v587_v49 = vpop.permute.xlu1 %586 }
 0x1c8   : > { %v592_v52 = vrot.slane %v587_v49, 4  ;;  %v684_v23 = vshll.u32 %v3914_v13, 16  ;;  %v696_v26 = vshll.u32 %v674_v14, 16 }
 0x1ca   : > { %v596_v55 = vsel %vm595_vm10, %v592_v52, %v587_v49  ;;  %v686_v36 = vrot.slane %v684_v23, 1  ;;  %v698_v39 = vrot.slane %v696_v26, 1  ;;  %v2679_v52 = vld [vmem:[#allocation9 + $0x178] sm:$0xf0] }
 0x1cb   : > { %v608_v57 = vsel %vm606_vm8, %v596_v55, %v607_v51  ;;  %v3202_v51 = vld [vmem:[#allocation9 + $0x174] sm:$0xf]  ;;  %v1030_v55 = vrot.slane %v674_v14, 1  ;;  %v2678_v14 = vor.u32 %v3203_v9, %v2677_v8  ;;  %vm1211_vm8 = vmand %vm1200_vm7, %vm473_vm14 }
 0x1cc   : > { %609 = vst [vmem:[#allocation2] sm:$0xff] %v608_v57  ;;  %v665_v15 = vunpack.c.l.b16 %v608_v57  ;;  %v666_v16 = vunpack.c.h.b16 %v608_v57  ;;  %v2682_v54 = vor.u32 %v3202_v51, %v2679_v52  ;;  %v2671_v57 = vld [vmem:[#allocation9 + $0x168] sm:$0xf0]  ;;  %vm1212_vm5 = vmor %vm1211_vm8, %vm3822_vm13  ;;  %vm1227_vm13 = vcmask 122880  }
 0x1cd   : > { %v2674_v59 = vor.u32 %v3200_v56, %v2671_v57  ;;  %vm3966_vm7 = vmand %vm1227_vm13, %vm462_vm3  ;;  %vm1298_vm13 = vcmask 1040512  }
 0x1ce   : > { %vm3977_vm8 = vmand %vm1206_vm12, %vm462_vm3 }
 0x1d0   : > { %v589_v0 = vpop.permute.xlu1 %588 }
 0x1d1   : > { %v593_v1 = vrot.slane %v589_v0, 4 }
 0x1d3   : > { %v597_v7 = vsel %vm595_vm10, %v593_v1, %v589_v0  ;;  %v3925_v35 = vld [vmem:[#allocation2] sm:$0xee]  ;;  %vm675_vm10 = vsmask.f32 7424  ;;  %v2694_v0 = vor.u32 %v3207_v61, %v2693_v60  ;;  %v2666_v1 = vor.u32 %v3198_v62, %v2663_v63 }
 0x1d4   : > { %613 = vst.msk [vmem:[#allocation2 + $0x8] sm:$0xff] %vm612_vm9, %v597_v7  ;;  %v1022_v43 = vunpack.c.h.b16 %v3925_v35  ;;  %v2658_v7 = vor.u32 %v3196_v4, %v2655_v5  ;;  %v1021_v23 = vunpack.c.l.b16 %v3925_v35  ;;  %v2645_v35 = vld [vmem:[#allocation9 + $0x130] sm:$0xf]  ;;  %v1186_v5 = vld [vmem:[%s4150_s5] sm:$0x3]  ;;  %vm1239_vm9 = vcmask 254080  }
 0x1db   : > { %v3912_v12 = vld [vmem:[#allocation2 + $0x8] sm:$0xff] }
 0x1dc   : > { %v667_v18 = vunpack.c.l.b16 %v3912_v12  ;;  %v668_v19 = vunpack.c.h.b16 %v3912_v12 }
 0x1de   : > { %v671_v20 = vpack.c.b16 %v667_v18, %v665_v15  ;;  %v3920_v21 = vpack.c.b16 %v668_v19, %v666_v16  ;;  %v1024_v49 = vpack.c.b16 %v668_v19, %v1022_v43  ;;  %v2650_v15 = vor.u32 %v3194_v10, %v2647_v11  ;;  %v2669_v16 = vld [vmem:[#allocation9 + $0x160] sm:$0xf]  ;;  %v3201_v19 = vld [vmem:[#allocation9 + $0x164] sm:$0xf0]  ;;  %v1217_v10 = vld [vmem:[#allocation3 + $0x20] sm:$0x1] }
 0x1df   : > { %v2670_v26 = vor.u32 %v3201_v19, %v2669_v16 }
 0x1e0   : > { %952 = vmatmul.bf16.vlgmr.msrb.gmra.mxu1 %v671_v20  ;;  %v679_v24 = vshll.u32 %v671_v20, 16  ;;  %v691_v25 = vshll.u32 %v3920_v21, 16  ;;  %v677_v31 = vshrl.u32 %v671_v20, 16  ;;  %v689_v33 = vshrl.u32 %v3920_v21, 16 }
 0x1e1   : > { %v1029_v53 = vrot.slane %v1024_v49, 1 }
 0x1e2   : > { %v681_v32 = vrot.slane %v679_v24, 1  ;;  %v693_v34 = vrot.slane %v691_v25, 1  ;;  %v2639_v24 = vld [vmem:[#allocation9 + $0x128] sm:$0xf0]  ;;  %v1023_v25 = vpack.c.b16 %v667_v18, %v1021_v23 }
 0x1e3   : > { %v3932_v58 = vsel %vm1025_vm4, %v1029_v53, %v1030_v55 }
 0x1e4   : > { %v682_v37 = vor.u32 %v681_v32, %v677_v31  ;;  %v694_v38 = vor.u32 %v693_v34, %v689_v33  ;;  %v1026_v30 = vrot.slane %v1023_v25, 1  ;;  %v2662_v31 = vor.u32 %v3199_v29, %v2661_v28  ;;  %v2653_v33 = vld [vmem:[#allocation9 + $0x140] sm:$0xf]  ;;  %v3197_v34 = vld [vmem:[#allocation9 + $0x144] sm:$0xf0] }
 0x1e5   : > { %v1027_v32 = vrot.slane %v3914_v13, 1  ;;  %v2654_v18 = vor.u32 %v3197_v34, %v2653_v33 }
 0x1e6   : > { %v687_v44 = vsel %vm675_vm10, %v682_v37, %v686_v36  ;;  %v699_v45 = vsel %vm675_vm10, %v694_v38, %v698_v39  ;;  %v3195_v36 = vld [vmem:[#allocation9 + $0x134] sm:$0xf0]  ;;  %v2637_v38 = vld [vmem:[#allocation9 + $0x120] sm:$0xf]  ;;  %v3193_v39 = vld [vmem:[#allocation9 + $0x124] sm:$0xf0] }
 0x1e7   : > { %803 = vmatmul.bf16.vlgmr.msra.gmra.mxu2 %v687_v44  ;;  %2559 = vmatmul.msk.bf16.vlgmr.msra.gmra.mxu3 %vm791_vm15, %v699_v45  ;;  %v1028_v12 = vsel %vm1025_vm4, %v1026_v30, %v1027_v32  ;;  %v2646_v37 = vor.u32 %v3195_v36, %v2645_v35  ;;  %v2638_v13 = vor.u32 %v3193_v39, %v2637_v38 }
 0x1e8   : > { %831 = vmatmul.bf16.vlgmr.msrb.gmra.mxu0 %v687_v44  ;;  %965 = vmatpush.bf16.msra.mxu3 %v2628_v41  ;;  %v2701_v41 = vld [vmem:[#allocation9 + $0x1a0] sm:$0xf] }
 0x1e9   : > { %1154 = vmatpush.bf16.msrb.mxu0 %v2698_v42  ;;  %v3209_v42 = vld [vmem:[#allocation9 + $0x1a4] sm:$0xf0] }
 0x1ea   : > { %v2702_v43 = vor.u32 %v3209_v42, %v2701_v41 }
 0x1ed   : > { %1155 = vmatpush.bf16.msrb.mxu0 %v2690_v50 }
 0x1f0   : > { %2708 = vmatmul.msk.bf16.vlgmr.msra.gmra.mxu1 %vm791_vm15, %v3932_v58 }
 0x1f1   : > { %1156 = vmatpush.bf16.msrb.mxu0 %v2682_v54 }
 0x1f5   : > { %1157 = vmatpush.bf16.msrb.mxu0 %v2674_v59 }
 0x1f7   : > { %2560 = vmatmul.msk.bf16.vlgmr.msrb.gmra.mxu3 %vm791_vm15, %v699_v45  ;;  %980 = vmatmul.bf16.vlgmr.msrb.gmra.mxu2 %v671_v20  ;;  %v3192_v20 = vld [vmem:[#allocation9 + $0x124] sm:$0xf] }
 0x1f8   : > { %2634 = vmatmul.msk.bf16.vlgmr.msra.gmra.mxu0 %vm791_vm15, %v3920_v21  ;;  %1126 = vmatpush.bf16.msrb.mxu3 %v2694_v0  ;;  %v2642_v27 = vor.u32 %v3192_v20, %v2639_v24  ;;  %v1218_v20 = vsel %vm1216_vm6, 0, %v1217_v10  ;;  %v3281_v10 = vld [vmem:[#allocation10 + $0x234] sm:$0xf0] }
 0x1f9   : > { %1158 = vmatpush.bf16.msrb.mxu0 %v2666_v1  ;;  %v1203_v1 = vld [vmem:[#allocation3] sm:$0x11]  ;;  %1219 = vst [vmem:[#allocation3 + $0x20] sm:$0x1] %v1218_v20 }
 0x1fa   : > { %v1204_v9 = vsel %vm1202_vm1, 0, %v1203_v1  ;;  %vm1240_vm1 = vmand %vm1239_vm9, %vm462_vm3 }
 0x1fb   : > { %1205 = vst [vmem:[#allocation3] sm:$0x11] %v1204_v9  ;;  %v2847_v9 = vld [vmem:[#allocation10 + $0x230] sm:$0xf]  ;;  %vm3996_vm9 = vmand %vm1298_vm13, %vm462_vm3 }
 0x1fc   : > { %1127 = vmatpush.bf16.msrb.mxu3 %v2686_v6  ;;  %v1213_v6 = vld [vmem:[#allocation3 + $0x18] sm:$0x11]  ;;  %vm1300_vm3 = vmor %vm3949_vm2, %vm3996_vm9  ;;  %vm1282_vm2 = vcmask 1043584  }
 0x1fd   : > { %1159 = vmatpush.bf16.msrb.mxu0 %v2658_v7  ;;  %v1214_v17 = vsel %vm1212_vm5, 0, %v1213_v6  ;;  %v3275_v6 = vld [vmem:[#allocation10 + $0x204] sm:$0xf0]  ;;  %vm1232_vm5 = vcmask 257152  }
 0x1fe   : > { %1215 = vst [vmem:[#allocation3 + $0x18] sm:$0x11] %v1214_v17  ;;  %v2807_v17 = vld [vmem:[#allocation10 + $0x1e0] sm:$0xf]  ;;  %vm1233_vm6 = vmand %vm1232_vm5, %vm471_vm11 }
 0x1ff   : > { %1238 = vst.msk [vmem:[#allocation3 + $0x14] sm:$0xf] %vm1232_vm5, %v3611_v48 }
 0x200   : > { %1128 = vmatpush.bf16.msrb.mxu3 %v2678_v14  ;;  %v1241_v41 = vld [vmem:[#allocation3 + $0x20] sm:$0x1] }
 0x201   : > { %1160 = vmatpush.bf16.msrb.mxu0 %v2650_v15  ;;  %v1189_v15 = vperm.slane %v1186_v5, 1 }
 0x204   : > { %1129 = vmatpush.bf16.msrb.mxu3 %v2670_v26 }
 0x205   : > { %1161 = vmatpush.bf16.msrb.mxu0 %v2642_v27  ;;  %v1188_v27 = vperm.slane %v1186_v5, 0  ;;  %v2823_v5 = vld [vmem:[#allocation10 + $0x200] sm:$0xf] }
 0x206   : > { %v2824_v40 = vor.u32 %v3275_v6, %v2823_v5  ;;  %v2735_v6 = vld [vmem:[#allocation10 + $0x150] sm:$0xf] }
 0x207   : > { %2633 = vmatmul.msk.bf16.vlgmr.msra.gmra.mxu3 %vm791_vm15, %v3920_v21 }
 0x208   : > { %1162 = vmatmul.bf16.vlgmr.msrb.gmra.mxu0 %v1028_v12  ;;  %1130 = vmatpush.bf16.msrb.mxu3 %v2662_v31 }
 0x20c   : > { %1131 = vmatpush.bf16.msrb.mxu3 %v2654_v18 }
 0x210   : > { %1132 = vmatpush.bf16.msrb.mxu3 %v2646_v37  ;;  %v1229_v37 = vld [vmem:[#allocation3 + $0x18] sm:$0x1] }
 0x211   : > { %v1230_v39 = vsel %vm3966_vm7, 0, %v1229_v37  ;;  %v3269_v37 = vld [vmem:[#allocation10 + $0x1d4] sm:$0xf0] }
 0x212   : > { %1231 = vst [vmem:[#allocation3 + $0x18] sm:$0x1] %v1230_v39  ;;  %v2761_v39 = vld [vmem:[#allocation10 + $0x188] sm:$0xf0] }
 0x214   : > { %1133 = vmatpush.bf16.msrb.mxu3 %v2638_v13 }
 0x217   : > { %1134 = vmatmul.bf16.vlgmr.msrb.gmra.mxu3 %v1028_v12 }
 0x218   : > { %1147 = vmatpush.bf16.msra.mxu3 %v2702_v43 }
 0x227   : > { %2707 = vmatmul.msk.bf16.vlgmr.msra.gmra.mxu3 %vm791_vm15, %v3932_v58 }
 0x25d   : > { %v953_v53 = vpop.f32.mrf.mxu1 }
 0x265   : > { %v832_v45 = vpop.f32.mrf.mxu0  ;;  %v955_v57 = vpop.f32.mrf.mxu1 }
 0x26a   : > { %v818_v21 = vpop.f32.mrf.mxu3  ;;  %v804_v51 = vpop.f32.mrf.mxu2 }
 0x26b   : > { %v819_v2 = vadd.f32 %v818_v21, %v804_v51  ;;  %v1242_v21 = vsel %vm1240_vm1, 0, %v1241_v41  ;;  %v3276_v41 = vld [vmem:[#allocation10 + $0x214] sm:$0xf]  ;;  %vm4014_vm1 = vmand %vm1282_vm2, %vm471_vm11 }
 0x26c   : > { %1243 = vst [vmem:[#allocation3 + $0x20] sm:$0x1] %v1242_v21  ;;  %v3257_v21 = vld [vmem:[#allocation10 + $0x174] sm:$0xf0] }
 0x26d   : > { %v834_v47 = vpop.f32.mrf.mxu0  ;;  %v1177_v63 = vpop.f32.mrf.mxu1  ;;  %v954_v16 = vadd.f32 %v953_v53, %v819_v2  ;;  %v1208_v2 = vld [vmem:[#allocation3 + $0x8] sm:$0x1] }
 0x272   : > { %v820_v44 = vpop.f32.mrf.mxu3  ;;  %v806_v55 = vpop.f32.mrf.mxu2 }
 0x273   : > { %v821_v28 = vadd.f32 %v820_v44, %v806_v55 }
 0x275   : > { %v995_v52 = vpop.f32.mrf.mxu0  ;;  %v1179_v22 = vpop.f32.mrf.mxu1  ;;  %v956_v35 = vadd.f32 %v955_v57, %v821_v28 }
 0x27a   : > { %v846_v46 = vpop.f32.mrf.mxu3  ;;  %v981_v61 = vpop.f32.mrf.mxu2 }
 0x27b   : > { %v847_v60 = vadd.f32 %v846_v46, %v832_v45 }
 0x27d   : > { %v997_v56 = vpop.f32.mrf.mxu0  ;;  %v982_v0 = vadd.f32 %v981_v61, %v847_v60 }
 0x27f   : > { %v996_v7 = vadd.f32 %v995_v52, %v982_v0 }
 0x282   : > { %v848_v49 = vpop.f32.mrf.mxu3  ;;  %v983_v11 = vpop.f32.mrf.mxu2 }
 0x283   : > { %v849_v8 = vadd.f32 %v848_v49, %v834_v47 }
 0x285   : > { %v1163_v62 = vpop.f32.mrf.mxu0  ;;  %v984_v24 = vadd.f32 %v983_v11, %v849_v8  ;;  %v3273_v8 = vld [vmem:[#allocation10 + $0x1f4] sm:$0xf0]  ;;  %v2848_v11 = vor.u32 %v3281_v10, %v2847_v9  ;;  %v3263_v10 = vld [vmem:[#allocation10 + $0x1a4] sm:$0xf0] }
 0x286   : > { %v1178_v3 = vadd.f32 %v1177_v63, %v1163_v62  ;;  %v2831_v63 = vld [vmem:[#allocation10 + $0x210] sm:$0xf] }
 0x287   : > { %v998_v32 = vadd.f32 %v997_v56, %v984_v24  ;;  %1662 = vmatpush.bf16.msrb.mxu1 %v2848_v11  ;;  %v3252_v11 = vld [vmem:[#allocation10 + $0x154] sm:$0xf] }
 0x288   : > { %v1183_v14 = vadd.f32 %v1178_v3, %v996_v7  ;;  %v1209_v3 = vsel %vm3977_vm8, 0, %v1208_v2  ;;  %v2815_v7 = vld [vmem:[#allocation10 + $0x1f0] sm:$0xf]  ;;  %v3272_v2 = vld [vmem:[#allocation10 + $0x1f4] sm:$0xf] }
 0x289   : > { %v2816_v20 = vor.u32 %v3273_v8, %v2815_v7  ;;  %1210 = vst [vmem:[#allocation3 + $0x8] sm:$0x1] %v1209_v3  ;;  %v2817_v3 = vld [vmem:[#allocation10 + $0x1f8] sm:$0xf0]  ;;  %v3253_v7 = vld [vmem:[#allocation10 + $0x154] sm:$0xf0] }
 0x28a   : > { %v967_v50 = vpop.f32.mrf.mxu3  ;;  %v1193_v29 = vadd.f32 %v1189_v15, %v1183_v14  ;;  %v2767_v14 = vld [vmem:[#allocation10 + $0x190] sm:$0xf]  ;;  %v2820_v5 = vor.u32 %v3272_v2, %v2817_v3  ;;  %v1304_v8 = vld [vmem:[#allocation3 + $0x20] sm:$0x1]  ;;  %v2736_v9 = vor.u32 %v3253_v7, %v2735_v6 }
 0x28b   : > { %v968_v25 = vadd.f32 %v967_v50, %v954_v16 }
 0x28c   : > { %v1197_v12 = vmax.f32 %v1193_v29, 0.0 }
 0x28d   : > { %v1165_v19 = vpop.f32.mrf.mxu0 }
 0x28e   : > { %v1180_v30 = vadd.f32 %v1179_v22, %v1165_v19  ;;  %v3260_v19 = vld [vmem:[#allocation10 + $0x194] sm:$0xf] }
 0x290   : > { %v1185_v18 = vadd.f32 %v1180_v30, %v998_v32  ;;  %v1234_v29 = vld [vmem:[#allocation3 + $0x8] sm:$0xf]  ;;  %v3279_v32 = vld [vmem:[#allocation10 + $0x224] sm:$0xf0] }
 0x291   : > { %v1235_v30 = vsel %vm1233_vm6, 0, %v1234_v29 }
 0x292   : > { %v969_v54 = vpop.f32.mrf.mxu3  ;;  %v1195_v44 = vadd.f32 %v1189_v15, %v1185_v18  ;;  %v3261_v15 = vld [vmem:[#allocation10 + $0x194] sm:$0xf0]  ;;  %1236 = vst [vmem:[#allocation3 + $0x8] sm:$0xf] %v1235_v30  ;;  %v3259_v18 = vld [vmem:[#allocation10 + $0x184] sm:$0xf0] }
 0x293   : > { %v970_v42 = vadd.f32 %v969_v54, %v956_v35  ;;  %v2768_v16 = vor.u32 %v3261_v15, %v2767_v14  ;;  %v2737_v14 = vld [vmem:[#allocation10 + $0x158] sm:$0xf0]  ;;  %v1301_v15 = vld [vmem:[#allocation3 + $0x18] sm:$0x11] }
 0x294   : > { %v1199_v51 = vmax.f32 %v1195_v44, 0.0 }
 0x295   : > { %1628 = vmatpush.bf16.msra.mxu2 %v2768_v16 }
 0x29a   : > { %v1135_v59 = vpop.f32.mrf.mxu3 }
 0x2a2   : > { %v1137_v58 = vpop.f32.mrf.mxu3 }
 0x2aa   : > { %v1149_v23 = vpop.f32.mrf.mxu3 }
 0x2ab   : > { %v1150_v26 = vadd.f32 %v1149_v23, %v1135_v59  ;;  %v2769_v23 = vld [vmem:[#allocation10 + $0x198] sm:$0xf0] }
 0x2ac   : > { %v2772_v24 = vor.u32 %v3260_v19, %v2769_v23  ;;  %v3270_v19 = vld [vmem:[#allocation10 + $0x1e4] sm:$0xf]  ;;  %v2809_v23 = vld [vmem:[#allocation10 + $0x1e8] sm:$0xf0] }
 0x2ad   : > { %v1182_v31 = vadd.f32 %v1150_v26, %v968_v25  ;;  %v1222_v25 = vld [vmem:[#allocation3] sm:$0xf]  ;;  %v3271_v26 = vld [vmem:[#allocation10 + $0x1e4] sm:$0xf0] }
 0x2ae   : > { %1670 = vmatpush.bf16.msra.mxu0 %v2772_v24  ;;  %v2808_v22 = vor.u32 %v3271_v26, %v2807_v17  ;;  %v2740_v17 = vor.u32 %v3252_v11, %v2737_v14  ;;  %v3225_v26 = vld [vmem:[#allocation10 + $0x74] sm:$0xf0]  ;;  %v2841_v11 = vld [vmem:[#allocation10 + $0x228] sm:$0xf0]  ;;  %v2881_v14 = vld [vmem:[#allocation10 + $0x30] sm:$0xf] }
 0x2af   : > { %v1192_v33 = vadd.f32 %v1188_v27, %v1182_v31  ;;  %v2839_v31 = vld [vmem:[#allocation10 + $0x220] sm:$0xf] }
 0x2b1   : > { %v1196_v36 = vmax.f32 %v1192_v33, 0.0  ;;  %v2840_v33 = vor.u32 %v3279_v32, %v2839_v31  ;;  %v3250_v32 = vld [vmem:[#allocation10 + $0x144] sm:$0xf] }
 0x2b2   : > { %v1151_v38 = vpop.f32.mrf.mxu3 }
 0x2b3   : > { %v1244_v13 = vpack.c.bf16 %v1197_v12, %v1196_v36  ;;  %v1152_v43 = vadd.f32 %v1151_v38, %v1137_v58  ;;  %v3277_v58 = vld [vmem:[#allocation10 + $0x214] sm:$0xf0]  ;;  %v2759_v12 = vld [vmem:[#allocation10 + $0x180] sm:$0xf]  ;;  %v2799_v36 = vld [vmem:[#allocation10 + $0x1d0] sm:$0xf]  ;;  %1663 = vmatpush.bf16.msrb.mxu1 %v2840_v33 }
 0x2b4   : > { %v2832_v0 = vor.u32 %v3277_v58, %v2831_v63  ;;  %v2760_v35 = vor.u32 %v3259_v18, %v2759_v12  ;;  %v2800_v38 = vor.u32 %v3269_v37, %v2799_v36  ;;  %v2745_v63 = vld [vmem:[#allocation10 + $0x168] sm:$0xf0]  ;;  %v3268_v12 = vld [vmem:[#allocation10 + $0x1d4] sm:$0xf]  ;;  %v2801_v18 = vld [vmem:[#allocation10 + $0x1d8] sm:$0xf0] }
 0x2b5   : > { %v1184_v45 = vadd.f32 %v1152_v43, %v970_v42  ;;  %v1247_v46 = vshrl.u32 %v1244_v13, 16  ;;  %v1250_v50 = vshll.u32 %v1244_v13, 16  ;;  %v2833_v13 = vld [vmem:[#allocation10 + $0x218] sm:$0xf0]  ;;  %v2751_v43 = vld [vmem:[#allocation10 + $0x170] sm:$0xf] }
 0x2b6   : > { %1642 = vmatpush.bf16.msrb.mxu3 %v2832_v0  ;;  %1629 = vmatpush.bf16.msra.mxu2 %v2760_v35  ;;  %v2836_v44 = vor.u32 %v3276_v41, %v2833_v13  ;;  %v2729_v33 = vld [vmem:[#allocation10 + $0x148] sm:$0xf0]  ;;  %v2905_v35 = vld [vmem:[#allocation10 + $0x60] sm:$0xf]  ;;  %v3249_v41 = vld [vmem:[#allocation10 + $0x134] sm:$0xf0]  ;;  %v2804_v13 = vor.u32 %v3268_v12, %v2801_v18 }
 0x2b7   : > { %v1194_v47 = vadd.f32 %v1188_v27, %v1184_v45  ;;  %v1249_v49 = vrot.slane %v1247_v46, 7  ;;  %v2752_v45 = vor.u32 %v3257_v21, %v2751_v43  ;;  %v2791_v46 = vld [vmem:[#allocation10 + $0x1c0] sm:$0xf]  ;;  %v3248_v21 = vld [vmem:[#allocation10 + $0x134] sm:$0xf] }
 0x2b8   : > { %1684 = vmatpush.bf16.msra.mxu1 %v2836_v44  ;;  %v2721_v44 = vld [vmem:[#allocation10 + $0x138] sm:$0xf0]  ;;  %v2865_v18 = vld [vmem:[#allocation10 + $0x10] sm:$0xf]  ;;  %v2857_v27 = vld [vmem:[#allocation10] sm:$0xf] }
 0x2b9   : > { %v1198_v52 = vmax.f32 %v1194_v47, 0.0  ;;  %v1252_v53 = vor.u32 %v1250_v50, %v1249_v49  ;;  %v1253_v60 = vrot.slane %v1249_v49, 4  ;;  %v3267_v47 = vld [vmem:[#allocation10 + $0x1c4] sm:$0xf0]  ;;  %v3256_v49 = vld [vmem:[#allocation10 + $0x174] sm:$0xf]  ;;  %v2724_v4 = vor.u32 %v3248_v21, %v2721_v44 }
 0x2ba   : > { %1643 = vmatpush.bf16.msrb.mxu3 %v2824_v40  ;;  %v2792_v50 = vor.u32 %v3267_v47, %v2791_v46  ;;  %1630 = vmatpush.bf16.msra.mxu2 %v2752_v45  ;;  %v2775_v40 = vld [vmem:[#allocation10 + $0x1a0] sm:$0xf]  ;;  %v3266_v45 = vld [vmem:[#allocation10 + $0x1c4] sm:$0xf]  ;;  %v2793_v46 = vld [vmem:[#allocation10 + $0x1c8] sm:$0xf0] }
 0x2bb   : > { %v1245_v55 = vpack.c.bf16 %v1199_v51, %v1198_v52  ;;  %1263 = vrot.lane.b32.xlu0 %v1252_v53, %s3612_s3  ;;  %v2753_v51 = vld [vmem:[#allocation10 + $0x178] sm:$0xf0]  ;;  %v3274_v52 = vld [vmem:[#allocation10 + $0x204] sm:$0xf]  ;;  %v2825_v53 = vld [vmem:[#allocation10 + $0x208] sm:$0xf0]  ;;  %v2776_v16 = vor.u32 %v3263_v10, %v2775_v40 }
 0x2bc   : > { %v2897_v47 = vld [vmem:[#allocation10 + $0x50] sm:$0xf]  ;;  %v3262_v40 = vld [vmem:[#allocation10 + $0x1a4] sm:$0xf] }
 0x2bd   : > { %v1255_v56 = vshrl.u32 %v1245_v55, 16  ;;  %v1258_v54 = vshll.u32 %v1245_v55, 16  ;;  %v2756_v55 = vor.u32 %v3256_v49, %v2753_v51  ;;  %v3221_v49 = vld [vmem:[#allocation10 + $0x54] sm:$0xf0]  ;;  %v3278_v10 = vld [vmem:[#allocation10 + $0x224] sm:$0xf] }
 0x2be   : > { %1644 = vmatpush.bf16.msrb.mxu3 %v2816_v20  ;;  %v2913_v20 = vld [vmem:[#allocation10 + $0x70] sm:$0xf]  ;;  %v2898_v51 = vor.u32 %v3221_v49, %v2897_v47 }
 0x2bf   : > { %v1257_v57 = vrot.slane %v1255_v56, 7  ;;  %v2828_v56 = vor.u32 %v3274_v52, %v2825_v53  ;;  %v2914_v30 = vor.u32 %v3225_v26, %v2913_v20  ;;  %v3247_v52 = vld [vmem:[#allocation10 + $0x124] sm:$0xf0]  ;;  %v3246_v53 = vld [vmem:[#allocation10 + $0x124] sm:$0xf] }
 0x2c0   : > { %v2985_v20 = vld [vmem:[#allocation10 + $0x100] sm:$0xf] }
 0x2c1   : > { %v1262_v59 = vrot.slane %v1257_v57, 4  ;;  %v1260_v61 = vor.u32 %v1258_v54, %v1257_v57  ;;  %v2743_v57 = vld [vmem:[#allocation10 + $0x160] sm:$0xf]  ;;  %v3255_v54 = vld [vmem:[#allocation10 + $0x164] sm:$0xf0]  ;;  %1685 = vmatpush.bf16.msra.mxu1 %v2828_v56  ;;  %v2796_v56 = vor.u32 %v3266_v45, %v2793_v46 }
 0x2c2   : > { %1645 = vmatpush.bf16.msrb.mxu3 %v2808_v22  ;;  %v3251_v22 = vld [vmem:[#allocation10 + $0x144] sm:$0xf0] }
 0x2c3   : > { %1267 = vrot.lane.b32.xlu2 %v1262_v59, %s3612_s3  ;;  %v1261_v62 = vsel %vm3842_vm0, %v1253_v60, %v1260_v61  ;;  %vm1220_vm0 = vcmask 125952   ;;  %v2783_v59 = vld [vmem:[#allocation10 + $0x1b0] sm:$0xf]  ;;  %v2744_v60 = vor.u32 %v3255_v54, %v2743_v57  ;;  %v3265_v61 = vld [vmem:[#allocation10 + $0x1b4] sm:$0xf0] }
 0x2c4   : > { %1265 = vrot.lane.b32.xlu1 %v1261_v62, %s3612_s3  ;;  %vm3985_vm12 = vmand %vm1220_vm0, %vm471_vm11  ;;  %1226 = vst.msk [vmem:[#allocation3 + $0xc] sm:$0xf] %vm1220_vm0, %v3611_v48  ;;  %v3258_v48 = vld [vmem:[#allocation10 + $0x184] sm:$0xf]  ;;  %v2784_v0 = vor.u32 %v3265_v61, %v2783_v59  ;;  %v3264_v57 = vld [vmem:[#allocation10 + $0x1b4] sm:$0xf] }
 0x2c5   : > { %v1223_v28 = vsel %vm3985_vm12, 0, %v1222_v25  ;;  %v2764_v42 = vor.u32 %v3258_v48, %v2761_v39  ;;  %v3254_v62 = vld [vmem:[#allocation10 + $0x164] sm:$0xf]  ;;  %1631 = vmatpush.bf16.msra.mxu2 %v2744_v60  ;;  %1686 = vmatpush.bf16.msra.mxu1 %v2820_v5  ;;  %v2812_v25 = vor.u32 %v3270_v19, %v2809_v23  ;;  %v3223_v48 = vld [vmem:[#allocation10 + $0x64] sm:$0xf0]  ;;  %v2844_v19 = vor.u32 %v3278_v10, %v2841_v11 }
 0x2c6   : > { %1224 = vst [vmem:[#allocation3] sm:$0xf] %v1223_v28  ;;  %1646 = vmatpush.bf16.msrb.mxu3 %v2800_v38  ;;  %v2748_v1 = vor.u32 %v3254_v62, %v2745_v63  ;;  %v2727_v28 = vld [vmem:[#allocation10 + $0x140] sm:$0xf]  ;;  %v2732_v38 = vor.u32 %v3250_v32, %v2729_v33  ;;  %v2719_v39 = vld [vmem:[#allocation10 + $0x130] sm:$0xf]  ;;  %v2906_v43 = vor.u32 %v3223_v48, %v2905_v35 }
 0x2c7   : > { %1671 = vmatpush.bf16.msra.mxu0 %v2764_v42  ;;  %v2728_v31 = vor.u32 %v3251_v22, %v2727_v28  ;;  %v2720_v34 = vor.u32 %v3249_v41, %v2719_v39  ;;  %v2785_v54 = vld [vmem:[#allocation10 + $0x1b8] sm:$0xf0]  ;;  %v3280_v59 = vld [vmem:[#allocation10 + $0x234] sm:$0xf]  ;;  %v2889_v62 = vld [vmem:[#allocation10 + $0x40] sm:$0xf] }
 0x2c8   : > { %v2849_v61 = vld [vmem:[#allocation10 + $0x238] sm:$0xf0]  ;;  %v3219_v63 = vld [vmem:[#allocation10 + $0x44] sm:$0xf0]  ;;  %v2788_v5 = vor.u32 %v3264_v57, %v2785_v54  ;;  %v3217_v23 = vld [vmem:[#allocation10 + $0x34] sm:$0xf0] }
 0x2c9   : > { %1632 = vmatpush.bf16.msra.mxu2 %v2736_v9  ;;  %1687 = vmatpush.bf16.msra.mxu1 %v2812_v25  ;;  %v2852_v58 = vor.u32 %v3280_v59, %v2849_v61  ;;  %v2890_v3 = vor.u32 %v3219_v63, %v2889_v62  ;;  %v2882_v26 = vor.u32 %v3217_v23, %v2881_v14  ;;  %v3243_v28 = vld [vmem:[#allocation10 + $0x104] sm:$0xf0]  ;;  %v2873_v32 = vld [vmem:[#allocation10 + $0x20] sm:$0xf]  ;;  %v3213_v35 = vld [vmem:[#allocation10 + $0x14] sm:$0xf0] }
 0x2ca   : > { %1647 = vmatpush.bf16.msrb.mxu3 %v2792_v50  ;;  %v2711_v50 = vld [vmem:[#allocation10 + $0x120] sm:$0xf]  ;;  %v2986_v22 = vor.u32 %v3243_v28, %v2985_v20  ;;  %v3215_v33 = vld [vmem:[#allocation10 + $0x24] sm:$0xf0]  ;;  %v3224_v54 = vld [vmem:[#allocation10 + $0x74] sm:$0xf] }
 0x2cb   : > { %1672 = vmatpush.bf16.msra.mxu0 %v2756_v55  ;;  %v2713_v55 = vld [vmem:[#allocation10 + $0x128] sm:$0xf0]  ;;  %v2712_v60 = vor.u32 %v3247_v52, %v2711_v50  ;;  %v2874_v12 = vor.u32 %v3215_v33, %v2873_v32  ;;  %v3211_v48 = vld [vmem:[#allocation10 + $0x4] sm:$0xf0]  ;;  %v2915_v63 = vld [vmem:[#allocation10 + $0x78] sm:$0xf0] }
 0x2cc   : > { %v2716_v2 = vor.u32 %v3246_v53, %v2713_v55  ;;  %v3244_v20 = vld [vmem:[#allocation10 + $0x114] sm:$0xf] }
 0x2cd   : > { %1633 = vmatpush.bf16.msra.mxu2 %v2728_v31  ;;  %1688 = vmatpush.bf16.msra.mxu1 %v2804_v13 }
 0x2ce   : > { %1648 = vmatpush.bf16.msrb.mxu3 %v2784_v0  ;;  %v2993_v0 = vld [vmem:[#allocation10 + $0x110] sm:$0xf] }
 0x2cf   : > { %1673 = vmatpush.bf16.msra.mxu0 %v2748_v1  ;;  %v3245_v1 = vld [vmem:[#allocation10 + $0x114] sm:$0xf0] }
 0x2d0   : > { %v2994_v6 = vor.u32 %v3245_v1, %v2993_v0 }
 0x2d1   : > { %1634 = vmatpush.bf16.msra.mxu2 %v2720_v34  ;;  %1689 = vmatpush.bf16.msra.mxu1 %v2796_v56 }
 0x2d2   : > { %1649 = vmatpush.bf16.msrb.mxu3 %v2776_v16 }
 0x2d3   : > { %1674 = vmatpush.bf16.msra.mxu0 %v2740_v17 }
 0x2d5   : > { %1635 = vmatpush.bf16.msra.mxu2 %v2712_v60  ;;  %1690 = vmatpush.bf16.msra.mxu1 %v2788_v5  ;;  %v3241_v5 = vld [vmem:[#allocation10 + $0xf4] sm:$0xf0] }
 0x2d6   : > { %1896 = vmatpush.bf16.msra.mxu3 %v2914_v30 }
 0x2d7   : > { %1675 = vmatpush.bf16.msra.mxu0 %v2732_v38 }
 0x2d9   : > { %1704 = vmatpush.bf16.msrb.mxu2 %v2852_v58 }
 0x2da   : > { %1897 = vmatpush.bf16.msra.mxu3 %v2906_v43 }
 0x2db   : > { %1676 = vmatpush.bf16.msra.mxu0 %v2724_v4 }
 0x2dd   : > { %1705 = vmatpush.bf16.msrb.mxu2 %v2844_v19  ;;  %v2918_v19 = vor.u32 %v3224_v54, %v2915_v63  ;;  %v3218_v63 = vld [vmem:[#allocation10 + $0x44] sm:$0xf] }
 0x2de   : > { %1898 = vmatpush.bf16.msra.mxu3 %v2898_v51 }
 0x2df   : > { %1677 = vmatpush.bf16.msra.mxu0 %v2716_v2 }
 0x2e2   : > { %1899 = vmatpush.bf16.msra.mxu3 %v2890_v3  ;;  %v2977_v3 = vld [vmem:[#allocation10 + $0xf0] sm:$0xf] }
 0x2e3   : > { %1930 = vmatpush.bf16.msrb.mxu0 %v2994_v6  ;;  %v2978_v32 = vor.u32 %v3241_v5, %v2977_v3  ;;  %v2953_v3 = vld [vmem:[#allocation10 + $0xc0] sm:$0xf]  ;;  %v3235_v5 = vld [vmem:[#allocation10 + $0xc4] sm:$0xf0] }
 0x2e6   : > { %1900 = vmatpush.bf16.msra.mxu3 %v2882_v26 }
 0x2e7   : > { %1931 = vmatpush.bf16.msrb.mxu0 %v2986_v22  ;;  %v3222_v22 = vld [vmem:[#allocation10 + $0x64] sm:$0xf] }
 0x2ea   : > { %1901 = vmatpush.bf16.msra.mxu3 %v2874_v12  ;;  %v2969_v12 = vld [vmem:[#allocation10 + $0xe0] sm:$0xf] }
 0x31d   : > { %v1268_v24 = vpop.permute.xlu2 %1267 }
 0x31e   : > { %v1271_v29 = vrot.slane %v1268_v24, 4 }
 0x320   : > { %v1275_v36 = vsel %vm791_vm15, %v1271_v29, %v1268_v24  ;;  %v1305_v37 = vsel %vm3966_vm7, %v1271_v29, %v1304_v8  ;;  %vm1284_vm7 = vcmask 1047556   ;;  %v2777_v8 = vld [vmem:[#allocation10 + $0x1a8] sm:$0xf0] }
 0x321   : > { %v1302_v42 = vsel %vm1300_vm3, %v1275_v36, %v1301_v15  ;;  %1306 = vst [vmem:[#allocation3 + $0x20] sm:$0x1] %v1305_v37  ;;  %vm4020_vm8 = vmand %vm1284_vm7, %vm473_vm14  ;;  %v1290_v15 = vld [vmem:[#allocation3 + $0x8] sm:$0xf]  ;;  %v2780_v17 = vor.u32 %v3262_v40, %v2777_v8  ;;  %v1287_v24 = vld [vmem:[#allocation3] sm:$0xff]  ;;  %v2866_v37 = vor.u32 %v3213_v35, %v2865_v18 }
 0x322   : > { %1303 = vst [vmem:[#allocation3 + $0x18] sm:$0x11] %v1302_v42  ;;  %vm1286_vm11 = vmor %vm4020_vm8, %vm4014_vm1  ;;  %v2858_v42 = vor.u32 %v3211_v48, %v2857_v27  ;;  %v3240_v40 = vld [vmem:[#allocation10 + $0xf4] sm:$0xf] }
 0x323   : > { %1691 = vmatpush.bf16.msra.mxu1 %v2780_v17  ;;  %vm1295_vm14 = vmor %vm1284_vm7, %vm1282_vm2  ;;  %1902 = vmatpush.bf16.msra.mxu3 %v2866_v37  ;;  %v3238_v37 = vld [vmem:[#allocation10 + $0xe4] sm:$0xf] }
 0x327   : > { %1903 = vmatpush.bf16.msra.mxu3 %v2858_v42  ;;  %v2987_v42 = vld [vmem:[#allocation10 + $0x108] sm:$0xf0] }
 0x328   : > { %v1348_v41 = vld [vmem:[#allocation3 + $0x20] sm:$0x1] }
 0x329   : > { %v1347_v13 = vld [vmem:[#allocation3 + $0x18] sm:$0x11]  ;;  %v1400_v43 = vunpack.c.l.b16 %v1348_v41 }
 0x32a   : > { %v1398_v21 = vunpack.c.l.b16 %v1347_v13  ;;  %v1399_v44 = vunpack.c.h.b16 %v1347_v13  ;;  %v3242_v41 = vld [vmem:[#allocation10 + $0x104] sm:$0xf]  ;;  %v3220_v13 = vld [vmem:[#allocation10 + $0x54] sm:$0xf] }
 0x32b   : > { %v4037_v46 = vpack.c.b16 %v1400_v43, %v1400_v43  ;;  %v2899_v43 = vld [vmem:[#allocation10 + $0x58] sm:$0xf0] }
 0x32c   : > { %v4042_v4 = vpack.c.b16 %v1398_v21, %v1398_v21  ;;  %v4044_v51 = vpack.c.b16 %v1399_v44, %v1399_v44 }
 0x32d   : > { %v1264_v16 = vpop.permute.xlu0 %1263  ;;  %v1439_v62 = vshll.u32 %v4037_v46, 16 }
 0x32e   : > { %v1269_v25 = vrot.slane %v1264_v16, 4  ;;  %v1415_v58 = vshll.u32 %v4042_v4, 16  ;;  %v1427_v0 = vshll.u32 %v4044_v51, 16 }
 0x32f   : > { %v1441_v17 = vrot.slane %v1439_v62, 1  ;;  %v2902_v62 = vor.u32 %v3220_v13, %v2899_v43  ;;  %v3107_v43 = vld [vmem:[#allocation10 + $0x310] sm:$0xf] }
 0x330   : > { %v1273_v29 = vsel %vm791_vm15, %v1269_v25, %v1264_v16  ;;  %v1291_v30 = vsel %vm3985_vm12, %v1269_v25, %v1290_v15  ;;  %v2979_v15 = vld [vmem:[#allocation10 + $0xf8] sm:$0xf0]  ;;  %v1417_v23 = vrot.slane %v1415_v58, 1  ;;  %v1429_v28 = vrot.slane %v1427_v0, 1  ;;  %v2891_v58 = vld [vmem:[#allocation10 + $0x48] sm:$0xf0] }
 0x331   : > { %v1288_v31 = vsel %vm1286_vm11, %v1273_v29, %v1287_v24  ;;  %1292 = vst [vmem:[#allocation3 + $0x8] sm:$0xf] %v1291_v30  ;;  %v2995_v24 = vld [vmem:[#allocation10 + $0x118] sm:$0xf0]  ;;  %v2907_v29 = vld [vmem:[#allocation10 + $0x68] sm:$0xf0]  ;;  %v2982_v33 = vor.u32 %v3240_v40, %v2979_v15  ;;  %v2894_v40 = vor.u32 %v3218_v63, %v2891_v58 }
 0x332   : > { %1289 = vst [vmem:[#allocation3] sm:$0xff] %v1288_v31  ;;  %v1392_v52 = vunpack.c.l.b16 %v1288_v31  ;;  %v1393_v55 = vunpack.c.h.b16 %v1288_v31  ;;  %v2998_v27 = vor.u32 %v3244_v20, %v2995_v24  ;;  %v3233_v15 = vld [vmem:[#allocation10 + $0xb4] sm:$0xf0]  ;;  %v3214_v24 = vld [vmem:[#allocation10 + $0x24] sm:$0xf] }
 0x333   : > { %v3313_v20 = vld [vmem:[#allocation10 + $0x334] sm:$0xf0]  ;;  %v3226_v63 = vld [vmem:[#allocation10 + $0x84] sm:$0xf]  ;;  %v2923_v58 = vld [vmem:[#allocation10 + $0x88] sm:$0xf0] }
 0x336   : > { %v1266_v36 = vpop.permute.xlu1 %1265 }
 0x337   : > { %v1270_v38 = vrot.slane %v1266_v36, 4 }
 0x338   : > { %v1308_v34 = vld [vmem:[#allocation3 + $0x8] sm:$0xf] }
 0x339   : > { %v1274_v39 = vsel %vm791_vm15, %v1270_v38, %v1266_v36  ;;  %1297 = vst.msk [vmem:[#allocation3 + $0x14] sm:$0xf] %vm1220_vm0, %v1270_v38  ;;  %v1394_v47 = vunpack.c.l.b16 %v1308_v34  ;;  %v4065_v8 = vld [vmem:[#allocation3] sm:$0xee]  ;;  %vm4201_vm15 = vcmask 261120  }
 0x33a   : > { %1296 = vst.msk [vmem:[#allocation3 + $0xc] sm:$0xff] %vm1295_vm14, %v1274_v39  ;;  %v2021_v30 = vunpack.c.l.b16 %v4065_v8  ;;  %v3239_v36 = vld [vmem:[#allocation10 + $0xe4] sm:$0xf0]  ;;  %v2971_v38 = vld [vmem:[#allocation10 + $0xe8] sm:$0xf0]  ;;  %v2910_v39 = vor.u32 %v3222_v22, %v2907_v29 }
 0x33b   : > { %v2970_v21 = vor.u32 %v3239_v36, %v2969_v12  ;;  %v2974_v44 = vor.u32 %v3238_v37, %v2971_v38  ;;  %v2961_v34 = vld [vmem:[#allocation10 + $0xd0] sm:$0xf]  ;;  %v2937_v22 = vld [vmem:[#allocation10 + $0xa0] sm:$0xf]  ;;  %v3311_v36 = vld [vmem:[#allocation10 + $0x324] sm:$0xf0] }
 0x33c   : > { %v3212_v37 = vld [vmem:[#allocation10 + $0x14] sm:$0xf]  ;;  %v2867_v38 = vld [vmem:[#allocation10 + $0x18] sm:$0xf0] }
 0x33d   : > { %v2870_v13 = vor.u32 %v3212_v37, %v2867_v38  ;;  %v3083_v38 = vld [vmem:[#allocation10 + $0x2e0] sm:$0xf] }
 0x340   : > { %v4035_v45 = vld [vmem:[#allocation3 + $0x14] sm:$0xf] }
 0x341   : > { %v1397_v49 = vunpack.c.l.b16 %v4035_v45  ;;  %v4040_v50 = vld [vmem:[#allocation3 + $0xc] sm:$0xff]  ;;  %v3101_v45 = vld [vmem:[#allocation10 + $0x308] sm:$0xf0] }
 0x342   : > { %v1395_v53 = vunpack.c.l.b16 %v4040_v50  ;;  %v1396_v56 = vunpack.c.h.b16 %v4040_v50 }
 0x343   : > { %v4050_v57 = vpack.c.b16 %v1397_v49, %v1394_v47  ;;  %v3237_v47 = vld [vmem:[#allocation10 + $0xd4] sm:$0xf0] }
 0x344   : > { %v4052_v59 = vpack.c.b16 %v1395_v53, %v1392_v52  ;;  %v4056_v60 = vpack.c.b16 %v1396_v56, %v1393_v55  ;;  %v2024_v48 = vpack.c.b16 %v1395_v53, %v2021_v30  ;;  %v3236_v52 = vld [vmem:[#allocation10 + $0xd4] sm:$0xf]  ;;  %v2963_v55 = vld [vmem:[#allocation10 + $0xd8] sm:$0xf0]  ;;  %v2990_v53 = vor.u32 %v3242_v41, %v2987_v42  ;;  %v3231_v30 = vld [vmem:[#allocation10 + $0xa4] sm:$0xf0] }
 0x345   : > { %v1434_v61 = vshll.u32 %v4050_v57, 16  ;;  %v1432_v6 = vshrl.u32 %v4050_v57, 16  ;;  %v3229_v41 = vld [vmem:[#allocation10 + $0x94] sm:$0xf0]  ;;  %v3228_v42 = vld [vmem:[#allocation10 + $0x94] sm:$0xf] }
 0x346   : > { %v1410_v1 = vshll.u32 %v4052_v59, 16  ;;  %v1422_v2 = vshll.u32 %v4056_v60, 16  ;;  %v1408_v9 = vshrl.u32 %v4052_v59, 16  ;;  %v1420_v11 = vshrl.u32 %v4056_v60, 16 }
 0x347   : > { %v1436_v7 = vrot.slane %v1434_v61, 1  ;;  %v2027_v54 = vrot.slane %v2024_v48, 1  ;;  %v2028_v61 = vrot.slane %v4042_v4, 1  ;;  %v2883_v4 = vld [vmem:[#allocation10 + $0x38] sm:$0xf0] }
 0x348   : > { %v1412_v10 = vrot.slane %v1410_v1, 1  ;;  %v1424_v14 = vrot.slane %v1422_v2, 1  ;;  %v2962_v1 = vor.u32 %v3237_v47, %v2961_v34  ;;  %v2966_v2 = vor.u32 %v3236_v52, %v2963_v55  ;;  %v2929_v48 = vld [vmem:[#allocation10 + $0x90] sm:$0xf]  ;;  %v2859_v34 = vld [vmem:[#allocation10 + $0x8] sm:$0xf0] }
 0x349   : > { %v1437_v16 = vor.u32 %v1436_v7, %v1432_v6  ;;  %v4082_v0 = vsel %vm1025_vm4, %v2027_v54, %v2028_v61  ;;  %v3234_v6 = vld [vmem:[#allocation10 + $0xc4] sm:$0xf]  ;;  %v2955_v7 = vld [vmem:[#allocation10 + $0xc8] sm:$0xf0]  ;;  %v2921_v47 = vld [vmem:[#allocation10 + $0x80] sm:$0xf]  ;;  %v2930_v52 = vor.u32 %v3229_v41, %v2929_v48 }
 0x34a   : > { %v1413_v25 = vor.u32 %v1412_v10, %v1408_v9  ;;  %v1425_v26 = vor.u32 %v1424_v14, %v1420_v11  ;;  %v3216_v9 = vld [vmem:[#allocation10 + $0x34] sm:$0xf]  ;;  %v2954_v10 = vor.u32 %v3235_v5, %v2953_v3  ;;  %v2958_v11 = vor.u32 %v3234_v6, %v2955_v7  ;;  %v2945_v14 = vld [vmem:[#allocation10 + $0xb0] sm:$0xf]  ;;  %v3317_v61 = vld [vmem:[#allocation10 + $0x354] sm:$0xf0] }
 0x34b   : > { %v4071_v31 = vsel %vm675_vm10, %v1437_v16, %v1441_v17  ;;  %v3232_v16 = vld [vmem:[#allocation10 + $0xb4] sm:$0xf]  ;;  %v2947_v17 = vld [vmem:[#allocation10 + $0xb8] sm:$0xf0]  ;;  %v3139_v54 = vld [vmem:[#allocation10 + $0x350] sm:$0xf] }
 0x34c   : > { %2853 = vmatmul.msk.bf16.vlgmr.msrb.gmra.mxu1 %vm4201_vm15, %v4071_v31  ;;  %v1418_v18 = vsel %vm675_vm10, %v1413_v25, %v1417_v23  ;;  %v4077_v35 = vsel %vm675_vm10, %v1425_v26, %v1429_v28  ;;  %v3123_v23 = vld [vmem:[#allocation10 + $0x330] sm:$0xf]  ;;  %v2875_v25 = vld [vmem:[#allocation10 + $0x28] sm:$0xf0]  ;;  %v2946_v26 = vor.u32 %v3233_v15, %v2945_v14  ;;  %v2950_v28 = vor.u32 %v3232_v16, %v2947_v17  ;;  %vm4202_vm10 = vmmov %vm4201_vm15 }
 0x34d   : > { %1938 = vmatpush.bf16.msrb.mxu1 %v2918_v19  ;;  %1636 = vmatmul.bf16.vlgmr.msra.gmra.mxu2 %v1418_v18  ;;  %v2886_v19 = vor.u32 %v3216_v9, %v2883_v4  ;;  %v3124_v29 = vor.u32 %v3313_v20, %v3123_v23  ;;  %v2878_v12 = vor.u32 %v3214_v24, %v2875_v25  ;;  %vm4203_vm0 = vmmov %vm4202_vm10  ;;  %v3297_v3 = vld [vmem:[#allocation10 + $0x2b4] sm:$0xf0]  ;;  %v3099_v5 = vld [vmem:[#allocation10 + $0x300] sm:$0xf] }
 0x34e   : > { %1650 = vmatmul.bf16.vlgmr.msrb.gmra.mxu3 %v4077_v35  ;;  %1678 = vmatmul.bf16.vlgmr.msra.gmra.mxu0 %v1418_v18  ;;  %v3115_v18 = vld [vmem:[#allocation10 + $0x320] sm:$0xf]  ;;  %v3307_v6 = vld [vmem:[#allocation10 + $0x304] sm:$0xf0]  ;;  %v3140_v7 = vor.u32 %v3317_v61, %v3139_v54  ;;  %v3061_v9 = vld [vmem:[#allocation10 + $0x2b8] sm:$0xf0] }
 0x34f   : > { %1910 = vmatpush.bf16.msra.mxu2 %v2978_v32  ;;  %1952 = vmatpush.bf16.msra.mxu0 %v2982_v33  ;;  %v3230_v32 = vld [vmem:[#allocation10 + $0xa4] sm:$0xf]  ;;  %v2939_v33 = vld [vmem:[#allocation10 + $0xa8] sm:$0xf0]  ;;  %v3100_v15 = vor.u32 %v3307_v6, %v3099_v5  ;;  %v3315_v16 = vld [vmem:[#allocation10 + $0x344] sm:$0xf0] }
 0x350   : > { %1972 = vmatpush.bf16.msrb.mxu3 %v2998_v27  ;;  %v2942_v27 = vor.u32 %v3230_v32, %v2939_v33  ;;  %v3051_v17 = vld [vmem:[#allocation10 + $0x2a0] sm:$0xf]  ;;  %v3091_v20 = vld [vmem:[#allocation10 + $0x2f0] sm:$0xf]  ;;  %v3305_v24 = vld [vmem:[#allocation10 + $0x2f4] sm:$0xf0] }
 0x351   : > { %1939 = vmatpush.bf16.msrb.mxu1 %v2910_v39  ;;  %v3116_v39 = vor.u32 %v3311_v36, %v3115_v18  ;;  %v3294_v25 = vld [vmem:[#allocation10 + $0x2a4] sm:$0xf]  ;;  %v3092_v32 = vor.u32 %v3305_v24, %v3091_v20  ;;  %v3043_v33 = vld [vmem:[#allocation10 + $0x290] sm:$0xf]  ;;  %v1981_v18 = vld [vmem:[#allocation3 + $0x8] sm:$0xe] }
 0x352   : > { %v3045_v48 = vld [vmem:[#allocation10 + $0x298] sm:$0xf0]  ;;  %v3117_v41 = vld [vmem:[#allocation10 + $0x328] sm:$0xf0]  ;;  %vm4204_vm12 = vmmov %vm4203_vm0  ;;  %v2031_v20 = vrot.slane %v4044_v51, 1 }
 0x353   : > { %1911 = vmatpush.bf16.msra.mxu2 %v2970_v21  ;;  %1953 = vmatpush.bf16.msra.mxu0 %v2974_v44  ;;  %v3309_v21 = vld [vmem:[#allocation10 + $0x314] sm:$0xf0]  ;;  %v3210_v44 = vld [vmem:[#allocation10 + $0x4] sm:$0xf]  ;;  %v3067_v5 = vld [vmem:[#allocation10 + $0x2c0] sm:$0xf] }
 0x354   : > { %1973 = vmatpush.bf16.msrb.mxu3 %v2990_v53  ;;  %v3227_v53 = vld [vmem:[#allocation10 + $0x84] sm:$0xf0]  ;;  %vm4205_vm5 = vmmov %vm4203_vm0 }
 0x355   : > { %1940 = vmatpush.bf16.msrb.mxu1 %v2902_v62  ;;  %v3108_v62 = vor.u32 %v3309_v21, %v3107_v43  ;;  %v2922_v4 = vor.u32 %v3227_v53, %v2921_v47  ;;  %v2023_v47 = vunpack.c.l.b16 %v1981_v18  ;;  %v3109_v53 = vld [vmem:[#allocation10 + $0x318] sm:$0xf0]  ;;  %v3299_v6 = vld [vmem:[#allocation10 + $0x2c4] sm:$0xf0] }
 0x357   : > { %1912 = vmatpush.bf16.msra.mxu2 %v2962_v1  ;;  %1954 = vmatpush.bf16.msra.mxu0 %v2966_v2  ;;  %v3059_v1 = vld [vmem:[#allocation10 + $0x2b0] sm:$0xf]  ;;  %v2862_v2 = vor.u32 %v3210_v44, %v2859_v34  ;;  %v3301_v34 = vld [vmem:[#allocation10 + $0x2d4] sm:$0xf0]  ;;  %v2026_v54 = vpack.c.b16 %v1397_v49, %v2023_v47 }
 0x358   : > { %v3060_v14 = vor.u32 %v3297_v3, %v3059_v1  ;;  %v3075_v44 = vld [vmem:[#allocation10 + $0x2d0] sm:$0xf] }
 0x359   : > { %1941 = vmatpush.bf16.msrb.mxu1 %v2894_v40  ;;  %v3296_v40 = vld [vmem:[#allocation10 + $0x2b4] sm:$0xf] }
 0x35a   : > { %v3064_v23 = vor.u32 %v3296_v40, %v3061_v9  ;;  %v3306_v40 = vld [vmem:[#allocation10 + $0x304] sm:$0xf]  ;;  %v3068_v9 = vor.u32 %v3299_v6, %v3067_v5 }
 0x35b   : > { %1913 = vmatpush.bf16.msra.mxu2 %v2954_v10  ;;  %1955 = vmatpush.bf16.msra.mxu0 %v2958_v11  ;;  %v2926_v10 = vor.u32 %v3226_v63, %v2923_v58  ;;  %v3131_v11 = vld [vmem:[#allocation10 + $0x340] sm:$0xf]  ;;  %v3027_v63 = vld [vmem:[#allocation10 + $0x270] sm:$0xf]  ;;  %v3289_v58 = vld [vmem:[#allocation10 + $0x274] sm:$0xf0] }
 0x35c   : > { %1692 = vmatmul.bf16.vlgmr.msra.gmra.mxu1 %v4077_v35  ;;  %v2938_v35 = vor.u32 %v3231_v30, %v2937_v22  ;;  %v3125_v22 = vld [vmem:[#allocation10 + $0x338] sm:$0xf0]  ;;  %v3028_v49 = vor.u32 %v3289_v58, %v3027_v63 }
 0x35d   : > { %1942 = vmatpush.bf16.msrb.mxu1 %v2886_v19  ;;  %2854 = vmatmul.msk.bf16.vlgmr.msrb.gmra.mxu2 %vm4202_vm10, %v4071_v31  ;;  %v2931_v31 = vld [vmem:[#allocation10 + $0x98] sm:$0xf0]  ;;  %v3295_v19 = vld [vmem:[#allocation10 + $0x2a4] sm:$0xf0] }
 0x35e   : > { %1904 = vmatmul.bf16.vlgmr.msra.gmra.mxu3 %v4052_v59  ;;  %2999 = vmatmul.msk.bf16.vlgmr.msrb.gmra.mxu0 %vm4203_vm0, %v4050_v57  ;;  %v2934_v55 = vor.u32 %v3228_v42, %v2931_v31  ;;  %v3052_v30 = vor.u32 %v3295_v19, %v3051_v17  ;;  %v3035_v31 = vld [vmem:[#allocation10 + $0x280] sm:$0xf]  ;;  %v3304_v17 = vld [vmem:[#allocation10 + $0x2f4] sm:$0xf]  ;;  %v3093_v19 = vld [vmem:[#allocation10 + $0x2f8] sm:$0xf0] }
 0x35f   : > { %1914 = vmatpush.bf16.msra.mxu2 %v2946_v26  ;;  %1956 = vmatpush.bf16.msra.mxu0 %v2950_v28  ;;  %v3053_v26 = vld [vmem:[#allocation10 + $0x2a8] sm:$0xf0]  ;;  %v3312_v28 = vld [vmem:[#allocation10 + $0x334] sm:$0xf] }
 0x360   : > { %2235 = vmatpush.bf16.msra.mxu3 %v3124_v29  ;;  %v3132_v29 = vor.u32 %v3315_v16, %v3131_v11  ;;  %v3056_v36 = vor.u32 %v3294_v25, %v3053_v26  ;;  %v3128_v37 = vor.u32 %v3312_v28, %v3125_v22  ;;  %v3019_v11 = vld [vmem:[#allocation10 + $0x260] sm:$0xf]  ;;  %v3021_v16 = vld [vmem:[#allocation10 + $0x268] sm:$0xf0]  ;;  %v3096_v28 = vor.u32 %v3304_v17, %v3093_v19  ;;  %v3011_v22 = vld [vmem:[#allocation10 + $0x250] sm:$0xf] }
 0x361   : > { %1943 = vmatpush.bf16.msrb.mxu1 %v2878_v12  ;;  %v3293_v12 = vld [vmem:[#allocation10 + $0x294] sm:$0xf0] }
 0x362   : > { %v3044_v42 = vor.u32 %v3293_v12, %v3043_v33  ;;  %v3013_v33 = vld [vmem:[#allocation10 + $0x258] sm:$0xf0]  ;;  %v3085_v12 = vld [vmem:[#allocation10 + $0x2e8] sm:$0xf0] }
 0x363   : > { %1915 = vmatpush.bf16.msra.mxu2 %v2938_v35  ;;  %1957 = vmatpush.bf16.msra.mxu0 %v2942_v27  ;;  %v3303_v35 = vld [vmem:[#allocation10 + $0x2e4] sm:$0xf0]  ;;  %v3292_v27 = vld [vmem:[#allocation10 + $0x294] sm:$0xf] }
 0x364   : > { %2236 = vmatpush.bf16.msra.mxu3 %v3116_v39  ;;  %v3310_v39 = vld [vmem:[#allocation10 + $0x324] sm:$0xf]  ;;  %v3048_v43 = vor.u32 %v3292_v27, %v3045_v48  ;;  %v3005_v27 = vld [vmem:[#allocation10 + $0x248] sm:$0xf0]  ;;  %v3300_v48 = vld [vmem:[#allocation10 + $0x2d4] sm:$0xf] }
 0x365   : > { %1944 = vmatpush.bf16.msrb.mxu1 %v2870_v13  ;;  %v3291_v13 = vld [vmem:[#allocation10 + $0x284] sm:$0xf0]  ;;  %v3120_v21 = vor.u32 %v3310_v39, %v3117_v41  ;;  %v3077_v39 = vld [vmem:[#allocation10 + $0x2d8] sm:$0xf0]  ;;  %v3316_v41 = vld [vmem:[#allocation10 + $0x354] sm:$0xf] }
 0x366   : > { %v3036_v61 = vor.u32 %v3291_v13, %v3035_v31  ;;  %v3080_v13 = vor.u32 %v3300_v48, %v3077_v39 }
 0x367   : > { %1916 = vmatpush.bf16.msra.mxu2 %v2930_v52  ;;  %1958 = vmatpush.bf16.msra.mxu0 %v2934_v55  ;;  %v3037_v52 = vld [vmem:[#allocation10 + $0x288] sm:$0xf0]  ;;  %v3308_v55 = vld [vmem:[#allocation10 + $0x314] sm:$0xf] }
 0x368   : > { %2237 = vmatpush.bf16.msra.mxu3 %v3108_v62  ;;  %v3076_v62 = vor.u32 %v3301_v34, %v3075_v44  ;;  %v3112_v3 = vor.u32 %v3308_v55, %v3109_v53  ;;  %v3069_v44 = vld [vmem:[#allocation10 + $0x2c8] sm:$0xf0]  ;;  %v3314_v34 = vld [vmem:[#allocation10 + $0x344] sm:$0xf] }
 0x369   : > { %1945 = vmatpush.bf16.msrb.mxu1 %v2862_v2 }
 0x36b   : > { %1917 = vmatpush.bf16.msra.mxu2 %v2922_v4  ;;  %1959 = vmatpush.bf16.msra.mxu0 %v2926_v10  ;;  %v2033_v4 = vrot.slane %v2026_v54, 1 }
 0x36c   : > { %2238 = vmatpush.bf16.msra.mxu3 %v3100_v15  ;;  %1946 = vmatmul.bf16.vlgmr.msrb.gmra.mxu1 %v4052_v59  ;;  %v3084_v59 = vor.u32 %v3303_v35, %v3083_v38  ;;  %v3286_v15 = vld [vmem:[#allocation10 + $0x264] sm:$0xf]  ;;  %v3283_v38 = vld [vmem:[#allocation10 + $0x244] sm:$0xf0] }
 0x36d   : > { %2255 = vmatpush.bf16.msra.mxu1 %v3140_v7  ;;  %v3288_v7 = vld [vmem:[#allocation10 + $0x274] sm:$0xf]  ;;  %v3024_v26 = vor.u32 %v3286_v15, %v3021_v16  ;;  %v3282_v35 = vld [vmem:[#allocation10 + $0x244] sm:$0xf] }
 0x36e   : > { %1918 = vmatmul.bf16.vlgmr.msra.gmra.mxu2 %v4056_v60  ;;  %1960 = vmatmul.bf16.vlgmr.msra.gmra.mxu0 %v4056_v60  ;;  %v3290_v60 = vld [vmem:[#allocation10 + $0x284] sm:$0xf]  ;;  %v3008_v31 = vor.u32 %v3282_v35, %v3005_v27 }
 0x36f   : > { %2221 = vmatpush.bf16.msrb.mxu2 %v3060_v14  ;;  %2263 = vmatpush.bf16.msrb.mxu0 %v3064_v23  ;;  %v3040_v2 = vor.u32 %v3290_v60, %v3037_v52  ;;  %v3287_v14 = vld [vmem:[#allocation10 + $0x264] sm:$0xf0]  ;;  %v2034_v23 = vrot.slane %v4037_v46, 1  ;;  %v3302_v46 = vld [vmem:[#allocation10 + $0x2e4] sm:$0xf] }
 0x370   : > { %3000 = vmatmul.msk.bf16.vlgmr.msrb.gmra.mxu3 %vm4204_vm12, %v4050_v57  ;;  %v2022_v57 = vunpack.c.h.b16 %v4065_v8  ;;  %v3029_v8 = vld [vmem:[#allocation10 + $0x278] sm:$0xf0]  ;;  %v3020_v24 = vor.u32 %v3287_v14, %v3019_v11  ;;  %v3133_v60 = vld [vmem:[#allocation10 + $0x348] sm:$0xf0] }
 0x371   : > { %2256 = vmatpush.bf16.msra.mxu1 %v3132_v29  ;;  %2239 = vmatpush.bf16.msra.mxu3 %v3092_v32  ;;  %v3032_v50 = vor.u32 %v3288_v7, %v3029_v8  ;;  %v2035_v25 = vsel %vm1025_vm4, %v2033_v4, %v2034_v23  ;;  %v3285_v29 = vld [vmem:[#allocation10 + $0x254] sm:$0xf0]  ;;  %v3136_v52 = vor.u32 %v3314_v34, %v3133_v60 }
 0x372   : > { %v2025_v1 = vpack.c.b16 %v1396_v56, %v2022_v57  ;;  %v3104_v56 = vor.u32 %v3306_v40, %v3101_v45  ;;  %v3012_v51 = vor.u32 %v3285_v29, %v3011_v22 }
 0x373   : > { %2222 = vmatpush.bf16.msrb.mxu2 %v3052_v30  ;;  %2264 = vmatpush.bf16.msrb.mxu0 %v3056_v36  ;;  %v3284_v30 = vld [vmem:[#allocation10 + $0x254] sm:$0xf]  ;;  %v3088_v36 = vor.u32 %v3302_v46, %v3085_v12 }
 0x374   : > { %v2030_v10 = vrot.slane %v2025_v1, 1  ;;  %v3016_v18 = vor.u32 %v3284_v30, %v3013_v33  ;;  %v2309_v12 = vld [vmem:[%s4152_s7] sm:$0x3] }
 0x375   : > { %2277 = vmatpush.bf16.msrb.mxu1 %v3128_v37  ;;  %2240 = vmatpush.bf16.msra.mxu3 %v3084_v59  ;;  %v3003_v37 = vld [vmem:[#allocation10 + $0x240] sm:$0xf]  ;;  %v2311_v48 = vperm.slane %v2309_v12, 0 }
 0x376   : > { %v2032_v32 = vsel %vm1025_vm4, %v2030_v10, %v2031_v20  ;;  %v3004_v59 = vor.u32 %v3283_v38, %v3003_v37  ;;  %vm4206_vm4 = vmmov %vm4203_vm0 }
 0x377   : > { %2223 = vmatpush.bf16.msrb.mxu2 %v3044_v42  ;;  %2265 = vmatpush.bf16.msrb.mxu0 %v3048_v43  ;;  %v3141_v42 = vld [vmem:[#allocation10 + $0x358] sm:$0xf0] }
 0x378   : > { %v3144_v43 = vor.u32 %v3316_v41, %v3141_v42 }
 0x379   : > { %2278 = vmatpush.bf16.msrb.mxu1 %v3120_v21  ;;  %2241 = vmatpush.bf16.msra.mxu3 %v3076_v62  ;;  %v3298_v21 = vld [vmem:[#allocation10 + $0x2c4] sm:$0xf] }
 0x37a   : > { %v3072_v47 = vor.u32 %v3298_v21, %v3069_v44 }
 0x37b   : > { %2224 = vmatpush.bf16.msrb.mxu2 %v3036_v61  ;;  %2266 = vmatpush.bf16.msrb.mxu0 %v3040_v2 }
 0x37c   : > { %3145 = vmatmul.msk.bf16.vlgmr.msra.gmra.mxu1 %vm4205_vm5, %v2035_v25 }
 0x37d   : > { %2279 = vmatpush.bf16.msrb.mxu1 %v3112_v3  ;;  %2242 = vmatpush.bf16.msra.mxu3 %v3068_v9 }
 0x37f   : > { %2225 = vmatpush.bf16.msrb.mxu2 %v3028_v49  ;;  %2267 = vmatpush.bf16.msrb.mxu0 %v3032_v50 }
 0x380   : > { %2243 = vmatmul.bf16.vlgmr.msra.gmra.mxu3 %v2032_v32 }
 0x381   : > { %2280 = vmatpush.bf16.msrb.mxu1 %v3104_v56 }
 0x383   : > { %2226 = vmatpush.bf16.msrb.mxu2 %v3020_v24  ;;  %2268 = vmatpush.bf16.msrb.mxu0 %v3024_v26 }
 0x385   : > { %2281 = vmatpush.bf16.msrb.mxu1 %v3096_v28 }
 0x387   : > { %2227 = vmatpush.bf16.msrb.mxu2 %v3012_v51  ;;  %2269 = vmatpush.bf16.msrb.mxu0 %v3016_v18 }
 0x389   : > { %2282 = vmatpush.bf16.msrb.mxu1 %v3088_v36 }
 0x38b   : > { %2228 = vmatpush.bf16.msrb.mxu2 %v3004_v59  ;;  %2270 = vmatpush.bf16.msrb.mxu0 %v3008_v31 }
 0x38d   : > { %2283 = vmatpush.bf16.msrb.mxu1 %v3080_v13 }
 0x38e   : > { %2229 = vmatmul.bf16.vlgmr.msrb.gmra.mxu2 %v4082_v0  ;;  %2271 = vmatmul.bf16.vlgmr.msrb.gmra.mxu0 %v4082_v0 }
 0x38f   : > { %2297 = vmatpush.bf16.msra.mxu2 %v3144_v43  ;;  %v2312_v43 = vperm.slane %v2309_v12, 1 }
 0x391   : > { %2284 = vmatpush.bf16.msrb.mxu1 %v3072_v47 }
 0x393   : > { %2298 = vmatpush.bf16.msra.mxu2 %v3136_v52 }
 0x394   : > { %2285 = vmatmul.bf16.vlgmr.msrb.gmra.mxu1 %v2032_v32 }
 0x39e   : > { %3146 = vmatmul.msk.bf16.vlgmr.msra.gmra.mxu2 %vm4206_vm4, %v2035_v25 }
 0x3c9   : > { %v1665_v55 = vpop.f32.mrf.mxu1 }
 0x3cb   : > { %v1679_v63 = vpop.f32.mrf.mxu0 }
 0x3d0   : > { %v1637_v57 = vpop.f32.mrf.mxu2 }
 0x3d1   : > { %v1667_v53 = vpop.f32.mrf.mxu1  ;;  %v1651_v54 = vpop.f32.mrf.mxu3 }
 0x3d2   : > { %v1652_v15 = vadd.f32 %v1651_v54, %v1637_v57 }
 0x3d3   : > { %v1681_v3 = vpop.f32.mrf.mxu0 }
 0x3d4   : > { %v1666_v19 = vadd.f32 %v1665_v55, %v1652_v15 }
 0x3d8   : > { %v1639_v62 = vpop.f32.mrf.mxu2 }
 0x3d9   : > { %v1693_v61 = vpop.f32.mrf.mxu1  ;;  %v1653_v58 = vpop.f32.mrf.mxu3 }
 0x3da   : > { %v1694_v23 = vadd.f32 %v1693_v61, %v1679_v63  ;;  %v1654_v25 = vadd.f32 %v1653_v58, %v1639_v62 }
 0x3db   : > { %v1933_v0 = vpop.f32.mrf.mxu0 }
 0x3dc   : > { %v1668_v33 = vadd.f32 %v1667_v53, %v1654_v25 }
 0x3e0   : > { %v1707_v2 = vpop.f32.mrf.mxu2 }
 0x3e1   : > { %v1695_v1 = vpop.f32.mrf.mxu1  ;;  %v1905_v5 = vpop.f32.mrf.mxu3  ;;  %v1708_v26 = vadd.f32 %v1707_v2, %v1694_v23 }
 0x3e2   : > { %v1906_v20 = vadd.f32 %v1905_v5, %v1666_v19  ;;  %v1696_v18 = vadd.f32 %v1695_v1, %v1681_v3 }
 0x3e3   : > { %v1935_v49 = vpop.f32.mrf.mxu0 }
 0x3e8   : > { %v1709_v7 = vpop.f32.mrf.mxu2 }
 0x3e9   : > { %v1947_v6 = vpop.f32.mrf.mxu1  ;;  %v1907_v8 = vpop.f32.mrf.mxu3  ;;  %v1710_v41 = vadd.f32 %v1709_v7, %v1696_v18 }
 0x3ea   : > { %v1948_v29 = vadd.f32 %v1947_v6, %v1708_v26  ;;  %v1908_v36 = vadd.f32 %v1907_v8, %v1668_v33 }
 0x3eb   : > { %v1961_v50 = vpop.f32.mrf.mxu0 }
 0x3ec   : > { %v1962_v37 = vadd.f32 %v1961_v50, %v1948_v29 }
 0x3f1   : > { %v1949_v40 = vpop.f32.mrf.mxu1  ;;  %v1919_v45 = vpop.f32.mrf.mxu2 }
 0x3f2   : > { %v1920_v22 = vadd.f32 %v1919_v45, %v1906_v20  ;;  %v1950_v21 = vadd.f32 %v1949_v40, %v1710_v41 }
 0x3f3   : > { %v1975_v9 = vpop.f32.mrf.mxu3  ;;  %v1963_v16 = vpop.f32.mrf.mxu0 }
 0x3f4   : > { %v1934_v51 = vadd.f32 %v1933_v0, %v1920_v22  ;;  %v1976_v59 = vadd.f32 %v1975_v9, %v1962_v37  ;;  %v1964_v53 = vadd.f32 %v1963_v16, %v1950_v21 }
 0x3f9   : > { %v2258_v4 = vpop.f32.mrf.mxu1  ;;  %v1921_v10 = vpop.f32.mrf.mxu2 }
 0x3fa   : > { %v1922_v31 = vadd.f32 %v1921_v10, %v1908_v36 }
 0x3fb   : > { %v1977_v56 = vpop.f32.mrf.mxu3 }
 0x3fc   : > { %v1936_v52 = vadd.f32 %v1935_v49, %v1922_v31  ;;  %v1978_v1 = vadd.f32 %v1977_v56, %v1964_v53 }
 0x401   : > { %v2260_v11 = vpop.f32.mrf.mxu1 }
 0x403   : > { %v2244_v17 = vpop.f32.mrf.mxu3 }
 0x40b   : > { %v2272_v46 = vpop.f32.mrf.mxu0  ;;  %v2246_v38 = vpop.f32.mrf.mxu3 }
 0x411   : > { %v2230_v14 = vpop.f32.mrf.mxu2  ;;  %v2286_v30 = vpop.f32.mrf.mxu1 }
 0x412   : > { %v2245_v24 = vadd.f32 %v2244_v17, %v2230_v14  ;;  %v2287_v35 = vadd.f32 %v2286_v30, %v2272_v46 }
 0x413   : > { %v2274_v57 = vpop.f32.mrf.mxu0 }
 0x414   : > { %v2259_v32 = vadd.f32 %v2258_v4, %v2245_v24 }
 0x416   : > { %v2305_v27 = vadd.f32 %v2259_v32, %v1934_v51 }
 0x418   : > { %v2315_v44 = vadd.f32 %v2311_v48, %v2305_v27 }
 0x419   : > { %v2232_v28 = vpop.f32.mrf.mxu2  ;;  %v2288_v47 = vpop.f32.mrf.mxu1 }
 0x41a   : > { %v2247_v39 = vadd.f32 %v2246_v38, %v2232_v28  ;;  %v2319_v54 = vmax.f32 %v2315_v44, 0.0  ;;  %v2289_v61 = vadd.f32 %v2288_v47, %v2274_v57 }
 0x41c   : > { %v2261_v34 = vadd.f32 %v2260_v11, %v2247_v39 }
 0x41e   : > { %v2307_v62 = vadd.f32 %v2261_v34, %v1936_v52 }
 0x420   : > { %v2317_v5 = vadd.f32 %v2311_v48, %v2307_v62 }
 0x421   : > { %v2300_v42 = vpop.f32.mrf.mxu2 }
 0x422   : > { %v2301_v13 = vadd.f32 %v2300_v42, %v2287_v35  ;;  %v2321_v0 = vmax.f32 %v2317_v5, 0.0 }
 0x424   : > { %v2306_v60 = vadd.f32 %v2301_v13, %v1976_v59 }
 0x426   : > { %v2316_v55 = vadd.f32 %v2312_v43, %v2306_v60 }
 0x428   : > { %v2320_v63 = vmax.f32 %v2316_v55, 0.0 }
 0x429   : > { %v2302_v58 = vpop.f32.mrf.mxu2 }
 0x42a   : > { %v2323_v2 = vpack.c.bf16 %v2320_v63, %v2319_v54  ;;  %v2303_v3 = vadd.f32 %v2302_v58, %v2289_v61 }
 0x42c   : > { %2325 = vst [vmem:[%s388_s23] sm:$0xff] %v2323_v2  ;;  %v2308_v6 = vadd.f32 %v2303_v3, %v1978_v1 }
 0x42e   : > { %v2318_v7 = vadd.f32 %v2312_v43, %v2308_v6 }
 0x430   : > { %v2322_v8 = vmax.f32 %v2318_v7, 0.0 }
 0x432   : > { %v2324_v40 = vpack.c.bf16 %v2322_v8, %v2321_v0 }
 0x434   : > { %2326 = vst [vmem:[%s388_s23 + $0x8] sm:$0xff] %v2324_v40 }
 0x435   : > { %3553 = shalt.err (!%p3550_p12)
}
 0x436   : > { %s3613_s17 = smov 128   ;;  %s3614_s24 = smov 8  }
 0x437   : > { %3333 = dma.vmem_to_hbm [thread:$0]  (%p3745_p3), %s2341_s19, 256, %s2343_s13, %s2328_s9, %s3613_s17, %s3613_s17, %s3614_s24  }
 0x438 PF: > { %s2357_s15 = sand.u32 1, %s3588_s27   ;;  %p4207_p13 = scmp.ge.s32.totalorder %s3600_s30, 2 }
 0x439   : > { %s2358_s11 = scalar_lea.sflag [#allocation6], %s2357_s15 }
 0x43a   : > { %p3350_p0 = pnand %p4207_p13, %p3695_p6 }
 0x43c   : > { %p3351_p5 = pneg %p3350_p0 }
 0x43e   : > { %3583 = dma.done.wait (%p3351_p5), %s2358_s11, 256  }
 0x43f   : > { %3585 = vsyncadd (%p3351_p5), %s2358_s11, 4294967040  ;;  %p23_p7 = scmp.ge.s32.totalorder %s3732_s21, 4   ;;  %s4208_s27 = smov %s3592_s28 }
 0x440   : > { %s4209_s28 = smov %s3596_s29  ;;  %s4210_s29 = smov %s3741_s22 }
 0x441   : > { %s4211_s30 = smov %s3732_s21  ;;  %25 = sbr.rel (!%p23_p7) target bundleno = 10 (0xa), region = 116 }
 0x446   :  { %2364 = vsyncpa [#allocation5], 1 }
 0x447   :  { %2366 = vsyncpa [#allocation5 + $0x1], 1 }
 0x448   :  { %2367 = vsyncpa [#allocation8], 1 }
 0x449   :  { %2368 = vsyncpa [#allocation11], 1 }
 0x44a   :  { %2369 = vsyncpa [#allocation6], 1 }
 0x44b   :  { %2371 = vsyncpa [#allocation6 + $0x1], 1 }

</bundles_post_ra>
